<compile_context>
chip_gen: v5e
topology: v5e:2x2
jax: 0.10.0
libtpu: 0.0.40
codegen_flags: <defaults>
</compile_context>

<pallas_src>
import functools

import numpy as np

import jax
import jax.numpy as jnp
from jax.experimental import pallas as pl
from jax.experimental.pallas import tpu as pltpu


# ---------------------------------------------------------------------------
# In-kernel helpers.
# ---------------------------------------------------------------------------
def _mxu(a, b):
    """bf16 x bf16 -> f32 MXU matmul (operands cast at the dot site)."""
    return jnp.dot(a.astype(jnp.bfloat16), b.astype(jnp.bfloat16),
                   preferred_element_type=jnp.float32)


# ---------------------------------------------------------------------------
# The fused LeNet5 kernel.
#
# Activation slab layout: rows = (spatial_h, batch) with batch minor,
# lanes = (channel, spatial_w) with w minor.  All gathers along the height
# axis are then contiguous static row slices.
# ---------------------------------------------------------------------------
def _lenet5_kernel(x_ref, g1_ref, b1_ref, g2_ref, b2_ref,
                   w1_ref, bf1_ref, w2_ref, bf2_ref, w3_ref, bf3_ref,
                   sl1e_ref, sl1o_ref, sr1e_ref, sr1o_ref,
                   sl2e_ref, sl2o_ref, sr2e_ref, sr2o_ref,
                   out_ref, *, batch):
    B = batch

    def pool(a, sle, slo, sre, sro):
        # 2x2 / stride-2 max pool via 0/1 selection matmuls (row stage then
        # lane stage); the max itself stays in f32 on the VPU.
        rm = jnp.maximum(_mxu(sle[...], a), _mxu(slo[...], a))
        return jnp.maximum(_mxu(rm, sre[...]), _mxu(rm, sro[...]))

    # ---- conv1 (5x5, pad=2) + bias + ReLU:  rows (i, b), lanes (c, j) ------
    xp = x_ref[...]                                          # (32*B, 28) f32
    acc1 = _mxu(xp[0:28 * B, :], g1_ref[0:28, :])
    for u in range(1, 5):
        acc1 = acc1 + _mxu(xp[u * B:(u + 28) * B, :],
                           g1_ref[u * 28:(u + 1) * 28, :])
    a1 = jnp.maximum(acc1 + b1_ref[...], 0.0)                # (28*B, 168)

    # ---- maxpool 2x2 -> rows (i2, b), lanes (c, j2) ------------------------
    p1 = pool(a1, sl1e_ref, sl1o_ref, sr1e_ref, sr1o_ref)    # (14*B, 84)

    # ---- conv2 (5x5, valid) + bias + ReLU:  rows (i, b), lanes (co, j) -----
    acc2 = _mxu(p1[0:10 * B, :], g2_ref[0:84, :])
    for u in range(1, 5):
        acc2 = acc2 + _mxu(p1[u * B:(u + 10) * B, :],
                           g2_ref[u * 84:(u + 1) * 84, :])
    a2 = jnp.maximum(acc2 + b2_ref[...], 0.0)                # (10*B, 160)

    # ---- maxpool 2x2 -> rows (i2, b), lanes (co, j2) -----------------------
    p2 = pool(a2, sl2e_ref, sl2o_ref, sr2e_ref, sr2o_ref)    # (5*B, 80)

    # ---- fc1 + ReLU (torch .view flatten folded into the weight layout) ----
    acc3 = _mxu(p2[0:B, :], w1_ref[0:80, :])
    for i2 in range(1, 5):
        acc3 = acc3 + _mxu(p2[i2 * B:(i2 + 1) * B, :],
                           w1_ref[i2 * 80:(i2 + 1) * 80, :])
    y1 = jnp.maximum(acc3 + bf1_ref[...], 0.0)               # (B, 120)

    # ---- fc2 + ReLU, fc3 + log_softmax -------------------------------------
    y2 = jnp.maximum(_mxu(y1, w2_ref[...]) + bf2_ref[...], 0.0)   # (B, 84)
    z = _mxu(y2, w3_ref[...]) + bf3_ref[...]                       # (B, 10)
    m = jnp.max(z, axis=-1, keepdims=True)
    s = z - m
    lse = jnp.log(jnp.sum(jnp.exp(s), axis=-1, keepdims=True))
    out_ref[...] = (s - lse).astype(out_ref.dtype)


# ---------------------------------------------------------------------------
# Host-side constant construction.
# ---------------------------------------------------------------------------
def _pool_selectors(b, h_in, c, w_in):
    """0/1 selection matrices (bf16) for a 2x2/stride-2 max pool on a slab
    whose rows are (h, batch) with batch minor and lanes (c, w) with w minor.

    Returns (left_even, left_odd, right_even, right_odd):
      left_par[(i2, bb), (h, bb')] = 1 iff h == 2*i2 + par and bb' == bb
      right_par[(ch, w), (ch', j2)] = 1 iff ch' == ch and w == 2*j2 + par
    """
    h_out, w_out = h_in // 2, w_in // 2
    rows = np.arange(h_out * b)
    i2, bb = rows // b, rows % b
    lefts = []
    for par in (0, 1):
        m = np.zeros((h_out * b, h_in * b), np.float32)
        m[rows, (2 * i2 + par) * b + bb] = 1.0
        lefts.append(m)
    q = np.arange(c * w_out)
    rights = []
    for par in (0, 1):
        m = np.zeros((c * w_in, c * w_out), np.float32)
        m[2 * q + par, q] = 1.0      # valid since w_in == 2 * w_out
        rights.append(m)
    return [jnp.asarray(m, jnp.bfloat16) for m in (*lefts, *rights)]


def init_params(key):
    """Torch default init: uniform +/- 1/sqrt(fan_in)."""
    def uniform(k, shape, fan_in):
        bound = 1.0 / (fan_in ** 0.5)
        return jax.random.uniform(k, shape, jnp.float32, -bound, bound)

    ks = jax.random.split(key, 10)
    return {
        "conv1_w": uniform(ks[0], (6, 1, 5, 5), 1 * 5 * 5),
        "conv1_b": uniform(ks[1], (6,), 1 * 5 * 5),
        "conv2_w": uniform(ks[2], (16, 6, 5, 5), 6 * 5 * 5),
        "conv2_b": uniform(ks[3], (16,), 6 * 5 * 5),
        "fc1_w": uniform(ks[4], (120, 400), 400),
        "fc1_b": uniform(ks[5], (120,), 400),
        "fc2_w": uniform(ks[6], (84, 120), 120),
        "fc2_b": uniform(ks[7], (84,), 120),
        "fc3_w": uniform(ks[8], (10, 84), 84),
        "fc3_b": uniform(ks[9], (10,), 84),
    }


def prepare_params(params):
    """One-time re-layout of the torch weights into GEMM-ready bf16 matrices."""
    f32, bf16 = jnp.float32, jnp.bfloat16
    w1 = params["conv1_w"].astype(f32).reshape(6, 5, 5)        # (c, u, v)
    w2 = params["conv2_w"].astype(f32)                         # (co, ci, u, v)
    v_i = jnp.arange(5)

    # conv1 Toeplitz expansion: G1[u*28+w, c*28+j] = w1[c,u,w-j+2] (else 0);
    # zero entries implement the pad=2 column padding.
    w_i = jnp.arange(28)
    j_i = jnp.arange(28)
    mask1 = (w_i[:, None, None] ==
             (j_i[None, None, :] + v_i[None, :, None] - 2)).astype(f32)
    G1 = jnp.einsum("cuv,wvj->uwcj", w1, mask1).reshape(5 * 28, 6 * 28)

    # conv2 Toeplitz expansion: G2[u*84+ci*14+p, co*10+j] = w2[co,ci,u,p-j].
    p_i = jnp.arange(14)
    j_i = jnp.arange(10)
    mask2 = (p_i[:, None, None] ==
             (j_i[None, None, :] + v_i[None, :, None])).astype(f32)
    G2 = jnp.einsum("oiuv,pvj->uipoj", w2, mask2).reshape(5 * 84, 16 * 10)

    # fc1: reorder rows from torch's (co, i2, j2) flatten to the kernel's
    # (i2, co, j2) slab order so the flatten disappears.
    W1 = params["fc1_w"].astype(f32).reshape(120, 16, 5, 5)
    W1 = W1.transpose(2, 1, 3, 0).reshape(400, 120)

    return {
        "G1": G1.astype(bf16),
        "b1": jnp.repeat(params["conv1_b"].astype(f32), 28)[None, :],   # (1,168)
        "G2": G2.astype(bf16),
        "b2": jnp.repeat(params["conv2_b"].astype(f32), 10)[None, :],   # (1,160)
        "W1": W1.astype(bf16),
        "bf1": params["fc1_b"].astype(f32)[None, :],
        "W2": params["fc2_w"].astype(f32).T.astype(bf16),
        "bf2": params["fc2_b"].astype(f32)[None, :],
        "W3": params["fc3_w"].astype(f32).T.astype(bf16),
        "bf3": params["fc3_b"].astype(f32)[None, :],
    }


@jax.jit
def lenet5_forward(kparams, x):
    B, C, H, W = x.shape
    assert (C, H, W) == (1, 28, 28), "LeNet5 expects 1x28x28 inputs"
    x = x.astype(jnp.float32)

    # Height-major / batch-minor input slab, zero-padded by 2 rows top/bottom:
    # row index = h_padded * B + b, columns = w.  (Column pad=2 lives in G1.)
    xs = jnp.transpose(x[:, 0, :, :], (1, 0, 2))          # (28, B, 28)
    xs = jnp.pad(xs, ((2, 2), (0, 0), (0, 0)))            # (32, B, 28)
    xs = xs.reshape(32 * B, 28)

    # Pool selection matrices (trace-time numpy constants; batch-dependent).
    sl1e, sl1o, sr1e, sr1o = _pool_selectors(B, 28, 6, 28)
    sl2e, sl2o, sr2e, sr2o = _pool_selectors(B, 10, 16, 10)

    inputs = (xs, kparams["G1"], kparams["b1"], kparams["G2"], kparams["b2"],
              kparams["W1"], kparams["bf1"], kparams["W2"], kparams["bf2"],
              kparams["W3"], kparams["bf3"],
              sl1e, sl1o, sr1e, sr1o, sl2e, sl2o, sr2e, sr2o)

    vmem_spec = pl.BlockSpec(memory_space=pltpu.MemorySpace.VMEM)
    return pl.pallas_call(
        functools.partial(_lenet5_kernel, batch=B),
        out_shape=jax.ShapeDtypeStruct((B, 10), jnp.float32),
        in_specs=[vmem_spec] * len(inputs),
        out_specs=vmem_spec,
    )(*inputs)


# ---------------------------------------------------------------------------
# Pure-JAX references (torch semantics) for correctness cross-checks.
# With bf16_matmul=True the reference mirrors the kernel's dtype policy
# (bf16 MXU operands, f32 accumulate, f32 elementwise), so it should match
# the kernel to accumulation-order noise.
# ---------------------------------------------------------------------------
def lenet5_reference(params, x, *, bf16_matmul=False):
    cast = (lambda a: a.astype(jnp.bfloat16)) if bf16_matmul else (lambda a: a)

    def conv(a, w, pad):
        return jax.lax.conv_general_dilated(
            cast(a), cast(w), (1, 1), pad,
            dimension_numbers=("NCHW", "OIHW", "NCHW"),
            preferred_element_type=jnp.float32)

    def dense(a, w, b):
        return jnp.dot(cast(a), cast(w.T),
                       preferred_element_type=jnp.float32) + b

    y = jax.nn.relu(conv(x, params["conv1_w"], ((2, 2), (2, 2)))
                    + params["conv1_b"][None, :, None, None])
    y = jax.lax.reduce_window(y, -jnp.inf, jax.lax.max,
                              (1, 1, 2, 2), (1, 1, 2, 2), "VALID")
    y = jax.nn.relu(conv(y, params["conv2_w"], ((0, 0), (0, 0)))
                    + params["conv2_b"][None, :, None, None])
    y = jax.lax.reduce_window(y, -jnp.inf, jax.lax.max,
                              (1, 1, 2, 2), (1, 1, 2, 2), "VALID")
    y = y.reshape(y.shape[0], -1)
    y = jax.nn.relu(dense(y, params["fc1_w"], params["fc1_b"]))
    y = jax.nn.relu(dense(y, params["fc2_w"], params["fc2_b"]))
    y = dense(y, params["fc3_w"], params["fc3_b"])
    return jax.nn.log_softmax(y, axis=-1)


if __name__ == "__main__":
    key = jax.random.PRNGKey(0)
    pkey, xkey = jax.random.split(key)
    params = init_params(pkey)
    kparams = prepare_params(params)

    # LeNet5's fc1 (16*5*5) implies 1x28x28 inputs; keep batch small.
    x = jax.random.normal(xkey, (2, 1, 28, 28), jnp.float32)

    out = jax.block_until_ready(lenet5_forward(kparams, x))
    assert out.shape == (2, 10), out.shape

    # log_softmax rows must exponentiate-sum to ~1
    row_sums = jnp.sum(jnp.exp(out), axis=1)
    assert bool(jnp.all(jnp.abs(row_sums - 1.0) < 1e-4)), row_sums

    # tight check against a reference with the same bf16-MXU dtype policy
    ref_bf16 = lenet5_reference(params, x, bf16_matmul=True)
    err_bf16 = float(jnp.max(jnp.abs(out - ref_bf16)))
    assert err_bf16 < 5e-3, f"mismatch vs bf16-policy reference: {err_bf16}"

    # loose check against the exact f32 torch-semantics reference
    ref_f32 = lenet5_reference(params, x)
    err_f32 = float(jnp.max(jnp.abs(out - ref_f32)))
    assert err_f32 < 5e-2, f"mismatch vs f32 reference: {err_f32}"

    print("KERNEL_OK")
</pallas_src>

<mosaic_0001>
module attributes {stable_mosaic.version = 11 : i64} {
  func.func @_lenet5_kernel(%arg0: memref<64x28xf32, #tpu.memory_space<vmem>>, %arg1: memref<140x168xbf16, #tpu.memory_space<vmem>>, %arg2: memref<1x168xf32, #tpu.memory_space<vmem>>, %arg3: memref<420x160xbf16, #tpu.memory_space<vmem>>, %arg4: memref<1x160xf32, #tpu.memory_space<vmem>>, %arg5: memref<400x120xbf16, #tpu.memory_space<vmem>>, %arg6: memref<1x120xf32, #tpu.memory_space<vmem>>, %arg7: memref<120x84xbf16, #tpu.memory_space<vmem>>, %arg8: memref<1x84xf32, #tpu.memory_space<vmem>>, %arg9: memref<84x10xbf16, #tpu.memory_space<vmem>>, %arg10: memref<1x10xf32, #tpu.memory_space<vmem>>, %arg11: memref<28x56xbf16, #tpu.memory_space<vmem>>, %arg12: memref<28x56xbf16, #tpu.memory_space<vmem>>, %arg13: memref<168x84xbf16, #tpu.memory_space<vmem>>, %arg14: memref<168x84xbf16, #tpu.memory_space<vmem>>, %arg15: memref<10x20xbf16, #tpu.memory_space<vmem>>, %arg16: memref<10x20xbf16, #tpu.memory_space<vmem>>, %arg17: memref<160x80xbf16, #tpu.memory_space<vmem>>, %arg18: memref<160x80xbf16, #tpu.memory_space<vmem>>, %arg19: memref<2x10xf32, #tpu.memory_space<vmem>>) attributes {dimension_semantics = [], scalar_prefetch = 0 : i64, scratch_operands = 0 : i64, tpu.core_type = #tpu.core_type<tc>} {
    %c0 = arith.constant 0 : index
    %c0_0 = arith.constant 0 : index
    %0 = vector.load %arg0[%c0, %c0_0] : memref<64x28xf32, #tpu.memory_space<vmem>>, vector<64x28xf32>
    %1 = vector.extract_strided_slice %0 {offsets = [0, 0], sizes = [56, 28], strides = [1, 1]} : vector<64x28xf32> to vector<56x28xf32>
    %c0_1 = arith.constant 0 : index
    %c0_2 = arith.constant 0 : index
    %2 = vector.load %arg1[%c0_1, %c0_2] : memref<140x168xbf16, #tpu.memory_space<vmem>>, vector<28x168xbf16>
    %3 = arith.truncf %1 : vector<56x28xf32> to vector<56x28xbf16>
    %cst = arith.constant dense<0.000000e+00> : vector<56x168xf32>
    %4 = tpu.matmul %3, %2, %cst {dimension_numbers = #tpu.dot_dimension_numbers<[1], [0], [0], [1], [0, 0, 1, 1], [], []>} : vector<56x28xbf16>, vector<28x168xbf16>, vector<56x168xf32> -> vector<56x168xf32>
    %5 = vector.extract_strided_slice %0 {offsets = [2, 0], sizes = [56, 28], strides = [1, 1]} : vector<64x28xf32> to vector<56x28xf32>
    %c28 = arith.constant 28 : index
    %c0_3 = arith.constant 0 : index
    %6 = vector.load %arg1[%c28, %c0_3] : memref<140x168xbf16, #tpu.memory_space<vmem>>, vector<28x168xbf16>
    %7 = arith.truncf %5 : vector<56x28xf32> to vector<56x28xbf16>
    %cst_4 = arith.constant dense<0.000000e+00> : vector<56x168xf32>
    %8 = tpu.matmul %7, %6, %cst_4 {dimension_numbers = #tpu.dot_dimension_numbers<[1], [0], [0], [1], [0, 0, 1, 1], [], []>} : vector<56x28xbf16>, vector<28x168xbf16>, vector<56x168xf32> -> vector<56x168xf32>
    %9 = arith.addf %4, %8 : vector<56x168xf32>
    %10 = vector.extract_strided_slice %0 {offsets = [4, 0], sizes = [56, 28], strides = [1, 1]} : vector<64x28xf32> to vector<56x28xf32>
    %c56 = arith.constant 56 : index
    %c0_5 = arith.constant 0 : index
    %11 = vector.load %arg1[%c56, %c0_5] : memref<140x168xbf16, #tpu.memory_space<vmem>>, vector<28x168xbf16>
    %12 = arith.truncf %10 : vector<56x28xf32> to vector<56x28xbf16>
    %cst_6 = arith.constant dense<0.000000e+00> : vector<56x168xf32>
    %13 = tpu.matmul %12, %11, %cst_6 {dimension_numbers = #tpu.dot_dimension_numbers<[1], [0], [0], [1], [0, 0, 1, 1], [], []>} : vector<56x28xbf16>, vector<28x168xbf16>, vector<56x168xf32> -> vector<56x168xf32>
    %14 = arith.addf %9, %13 : vector<56x168xf32>
    %15 = vector.extract_strided_slice %0 {offsets = [6, 0], sizes = [56, 28], strides = [1, 1]} : vector<64x28xf32> to vector<56x28xf32>
    %c84 = arith.constant 84 : index
    %c0_7 = arith.constant 0 : index
    %16 = vector.load %arg1[%c84, %c0_7] : memref<140x168xbf16, #tpu.memory_space<vmem>>, vector<28x168xbf16>
    %17 = arith.truncf %15 : vector<56x28xf32> to vector<56x28xbf16>
    %cst_8 = arith.constant dense<0.000000e+00> : vector<56x168xf32>
    %18 = tpu.matmul %17, %16, %cst_8 {dimension_numbers = #tpu.dot_dimension_numbers<[1], [0], [0], [1], [0, 0, 1, 1], [], []>} : vector<56x28xbf16>, vector<28x168xbf16>, vector<56x168xf32> -> vector<56x168xf32>
    %19 = arith.addf %14, %18 : vector<56x168xf32>
    %20 = vector.extract_strided_slice %0 {offsets = [8, 0], sizes = [56, 28], strides = [1, 1]} : vector<64x28xf32> to vector<56x28xf32>
    %c112 = arith.constant 112 : index
    %c0_9 = arith.constant 0 : index
    %21 = vector.load %arg1[%c112, %c0_9] : memref<140x168xbf16, #tpu.memory_space<vmem>>, vector<28x168xbf16>
    %22 = arith.truncf %20 : vector<56x28xf32> to vector<56x28xbf16>
    %cst_10 = arith.constant dense<0.000000e+00> : vector<56x168xf32>
    %23 = tpu.matmul %22, %21, %cst_10 {dimension_numbers = #tpu.dot_dimension_numbers<[1], [0], [0], [1], [0, 0, 1, 1], [], []>} : vector<56x28xbf16>, vector<28x168xbf16>, vector<56x168xf32> -> vector<56x168xf32>
    %24 = arith.addf %19, %23 : vector<56x168xf32>
    %c0_11 = arith.constant 0 : index
    %c0_12 = arith.constant 0 : index
    %25 = vector.load %arg2[%c0_11, %c0_12] : memref<1x168xf32, #tpu.memory_space<vmem>>, vector<1x168xf32>
    %26 = vector.broadcast %25 : vector<1x168xf32> to vector<56x168xf32>
    %27 = arith.addf %24, %26 : vector<56x168xf32>
    %cst_13 = arith.constant 0.000000e+00 : f32
    %28 = vector.broadcast %cst_13 : f32 to vector<56x168xf32>
    %29 = arith.maximumf %27, %28 : vector<56x168xf32>
    %c0_14 = arith.constant 0 : index
    %c0_15 = arith.constant 0 : index
    %30 = vector.load %arg11[%c0_14, %c0_15] : memref<28x56xbf16, #tpu.memory_space<vmem>>, vector<28x56xbf16>
    %31 = arith.truncf %29 : vector<56x168xf32> to vector<56x168xbf16>
    %cst_16 = arith.constant dense<0.000000e+00> : vector<28x168xf32>
    %32 = tpu.matmul %30, %31, %cst_16 {dimension_numbers = #tpu.dot_dimension_numbers<[1], [0], [0], [1], [0, 0, 1, 1], [], []>} : vector<28x56xbf16>, vector<56x168xbf16>, vector<28x168xf32> -> vector<28x168xf32>
    %c0_17 = arith.constant 0 : index
    %c0_18 = arith.constant 0 : index
    %33 = vector.load %arg12[%c0_17, %c0_18] : memref<28x56xbf16, #tpu.memory_space<vmem>>, vector<28x56xbf16>
    %34 = arith.truncf %29 : vector<56x168xf32> to vector<56x168xbf16>
    %cst_19 = arith.constant dense<0.000000e+00> : vector<28x168xf32>
    %35 = tpu.matmul %33, %34, %cst_19 {dimension_numbers = #tpu.dot_dimension_numbers<[1], [0], [0], [1], [0, 0, 1, 1], [], []>} : vector<28x56xbf16>, vector<56x168xbf16>, vector<28x168xf32> -> vector<28x168xf32>
    %36 = arith.maximumf %32, %35 : vector<28x168xf32>
    %c0_20 = arith.constant 0 : index
    %c0_21 = arith.constant 0 : index
    %37 = vector.load %arg13[%c0_20, %c0_21] : memref<168x84xbf16, #tpu.memory_space<vmem>>, vector<168x84xbf16>
    %38 = arith.truncf %36 : vector<28x168xf32> to vector<28x168xbf16>
    %cst_22 = arith.constant dense<0.000000e+00> : vector<28x84xf32>
    %39 = tpu.matmul %38, %37, %cst_22 {dimension_numbers = #tpu.dot_dimension_numbers<[1], [0], [0], [1], [0, 0, 1, 1], [], []>} : vector<28x168xbf16>, vector<168x84xbf16>, vector<28x84xf32> -> vector<28x84xf32>
    %c0_23 = arith.constant 0 : index
    %c0_24 = arith.constant 0 : index
    %40 = vector.load %arg14[%c0_23, %c0_24] : memref<168x84xbf16, #tpu.memory_space<vmem>>, vector<168x84xbf16>
    %41 = arith.truncf %36 : vector<28x168xf32> to vector<28x168xbf16>
    %cst_25 = arith.constant dense<0.000000e+00> : vector<28x84xf32>
    %42 = tpu.matmul %41, %40, %cst_25 {dimension_numbers = #tpu.dot_dimension_numbers<[1], [0], [0], [1], [0, 0, 1, 1], [], []>} : vector<28x168xbf16>, vector<168x84xbf16>, vector<28x84xf32> -> vector<28x84xf32>
    %43 = arith.maximumf %39, %42 : vector<28x84xf32>
    %44 = vector.extract_strided_slice %43 {offsets = [0, 0], sizes = [20, 84], strides = [1, 1]} : vector<28x84xf32> to vector<20x84xf32>
    %c0_26 = arith.constant 0 : index
    %c0_27 = arith.constant 0 : index
    %45 = vector.load %arg3[%c0_26, %c0_27] : memref<420x160xbf16, #tpu.memory_space<vmem>>, vector<84x160xbf16>
    %46 = arith.truncf %44 : vector<20x84xf32> to vector<20x84xbf16>
    %cst_28 = arith.constant dense<0.000000e+00> : vector<20x160xf32>
    %47 = tpu.matmul %46, %45, %cst_28 {dimension_numbers = #tpu.dot_dimension_numbers<[1], [0], [0], [1], [0, 0, 1, 1], [], []>} : vector<20x84xbf16>, vector<84x160xbf16>, vector<20x160xf32> -> vector<20x160xf32>
    %48 = vector.extract_strided_slice %43 {offsets = [2, 0], sizes = [20, 84], strides = [1, 1]} : vector<28x84xf32> to vector<20x84xf32>
    %c84_29 = arith.constant 84 : index
    %c0_30 = arith.constant 0 : index
    %49 = vector.load %arg3[%c84_29, %c0_30] : memref<420x160xbf16, #tpu.memory_space<vmem>>, vector<84x160xbf16>
    %50 = arith.truncf %48 : vector<20x84xf32> to vector<20x84xbf16>
    %cst_31 = arith.constant dense<0.000000e+00> : vector<20x160xf32>
    %51 = tpu.matmul %50, %49, %cst_31 {dimension_numbers = #tpu.dot_dimension_numbers<[1], [0], [0], [1], [0, 0, 1, 1], [], []>} : vector<20x84xbf16>, vector<84x160xbf16>, vector<20x160xf32> -> vector<20x160xf32>
    %52 = arith.addf %47, %51 : vector<20x160xf32>
    %53 = vector.extract_strided_slice %43 {offsets = [4, 0], sizes = [20, 84], strides = [1, 1]} : vector<28x84xf32> to vector<20x84xf32>
    %c168 = arith.constant 168 : index
    %c0_32 = arith.constant 0 : index
    %54 = vector.load %arg3[%c168, %c0_32] : memref<420x160xbf16, #tpu.memory_space<vmem>>, vector<84x160xbf16>
    %55 = arith.truncf %53 : vector<20x84xf32> to vector<20x84xbf16>
    %cst_33 = arith.constant dense<0.000000e+00> : vector<20x160xf32>
    %56 = tpu.matmul %55, %54, %cst_33 {dimension_numbers = #tpu.dot_dimension_numbers<[1], [0], [0], [1], [0, 0, 1, 1], [], []>} : vector<20x84xbf16>, vector<84x160xbf16>, vector<20x160xf32> -> vector<20x160xf32>
    %57 = arith.addf %52, %56 : vector<20x160xf32>
    %58 = vector.extract_strided_slice %43 {offsets = [6, 0], sizes = [20, 84], strides = [1, 1]} : vector<28x84xf32> to vector<20x84xf32>
    %c252 = arith.constant 252 : index
    %c0_34 = arith.constant 0 : index
    %59 = vector.load %arg3[%c252, %c0_34] : memref<420x160xbf16, #tpu.memory_space<vmem>>, vector<84x160xbf16>
    %60 = arith.truncf %58 : vector<20x84xf32> to vector<20x84xbf16>
    %cst_35 = arith.constant dense<0.000000e+00> : vector<20x160xf32>
    %61 = tpu.matmul %60, %59, %cst_35 {dimension_numbers = #tpu.dot_dimension_numbers<[1], [0], [0], [1], [0, 0, 1, 1], [], []>} : vector<20x84xbf16>, vector<84x160xbf16>, vector<20x160xf32> -> vector<20x160xf32>
    %62 = arith.addf %57, %61 : vector<20x160xf32>
    %63 = vector.extract_strided_slice %43 {offsets = [8, 0], sizes = [20, 84], strides = [1, 1]} : vector<28x84xf32> to vector<20x84xf32>
    %c336 = arith.constant 336 : index
    %c0_36 = arith.constant 0 : index
    %64 = vector.load %arg3[%c336, %c0_36] : memref<420x160xbf16, #tpu.memory_space<vmem>>, vector<84x160xbf16>
    %65 = arith.truncf %63 : vector<20x84xf32> to vector<20x84xbf16>
    %cst_37 = arith.constant dense<0.000000e+00> : vector<20x160xf32>
    %66 = tpu.matmul %65, %64, %cst_37 {dimension_numbers = #tpu.dot_dimension_numbers<[1], [0], [0], [1], [0, 0, 1, 1], [], []>} : vector<20x84xbf16>, vector<84x160xbf16>, vector<20x160xf32> -> vector<20x160xf32>
    %67 = arith.addf %62, %66 : vector<20x160xf32>
    %c0_38 = arith.constant 0 : index
    %c0_39 = arith.constant 0 : index
    %68 = vector.load %arg4[%c0_38, %c0_39] : memref<1x160xf32, #tpu.memory_space<vmem>>, vector<1x160xf32>
    %69 = vector.broadcast %68 : vector<1x160xf32> to vector<20x160xf32>
    %70 = arith.addf %67, %69 : vector<20x160xf32>
    %cst_40 = arith.constant 0.000000e+00 : f32
    %71 = vector.broadcast %cst_40 : f32 to vector<20x160xf32>
    %72 = arith.maximumf %70, %71 : vector<20x160xf32>
    %c0_41 = arith.constant 0 : index
    %c0_42 = arith.constant 0 : index
    %73 = vector.load %arg15[%c0_41, %c0_42] : memref<10x20xbf16, #tpu.memory_space<vmem>>, vector<10x20xbf16>
    %74 = arith.truncf %72 : vector<20x160xf32> to vector<20x160xbf16>
    %cst_43 = arith.constant dense<0.000000e+00> : vector<10x160xf32>
    %75 = tpu.matmul %73, %74, %cst_43 {dimension_numbers = #tpu.dot_dimension_numbers<[1], [0], [0], [1], [0, 0, 1, 1], [], []>} : vector<10x20xbf16>, vector<20x160xbf16>, vector<10x160xf32> -> vector<10x160xf32>
    %c0_44 = arith.constant 0 : index
    %c0_45 = arith.constant 0 : index
    %76 = vector.load %arg16[%c0_44, %c0_45] : memref<10x20xbf16, #tpu.memory_space<vmem>>, vector<10x20xbf16>
    %77 = arith.truncf %72 : vector<20x160xf32> to vector<20x160xbf16>
    %cst_46 = arith.constant dense<0.000000e+00> : vector<10x160xf32>
    %78 = tpu.matmul %76, %77, %cst_46 {dimension_numbers = #tpu.dot_dimension_numbers<[1], [0], [0], [1], [0, 0, 1, 1], [], []>} : vector<10x20xbf16>, vector<20x160xbf16>, vector<10x160xf32> -> vector<10x160xf32>
    %79 = arith.maximumf %75, %78 : vector<10x160xf32>
    %c0_47 = arith.constant 0 : index
    %c0_48 = arith.constant 0 : index
    %80 = vector.load %arg17[%c0_47, %c0_48] : memref<160x80xbf16, #tpu.memory_space<vmem>>, vector<160x80xbf16>
    %81 = arith.truncf %79 : vector<10x160xf32> to vector<10x160xbf16>
    %cst_49 = arith.constant dense<0.000000e+00> : vector<10x80xf32>
    %82 = tpu.matmul %81, %80, %cst_49 {dimension_numbers = #tpu.dot_dimension_numbers<[1], [0], [0], [1], [0, 0, 1, 1], [], []>} : vector<10x160xbf16>, vector<160x80xbf16>, vector<10x80xf32> -> vector<10x80xf32>
    %c0_50 = arith.constant 0 : index
    %c0_51 = arith.constant 0 : index
    %83 = vector.load %arg18[%c0_50, %c0_51] : memref<160x80xbf16, #tpu.memory_space<vmem>>, vector<160x80xbf16>
    %84 = arith.truncf %79 : vector<10x160xf32> to vector<10x160xbf16>
    %cst_52 = arith.constant dense<0.000000e+00> : vector<10x80xf32>
    %85 = tpu.matmul %84, %83, %cst_52 {dimension_numbers = #tpu.dot_dimension_numbers<[1], [0], [0], [1], [0, 0, 1, 1], [], []>} : vector<10x160xbf16>, vector<160x80xbf16>, vector<10x80xf32> -> vector<10x80xf32>
    %86 = arith.maximumf %82, %85 : vector<10x80xf32>
    %87 = vector.extract_strided_slice %86 {offsets = [0, 0], sizes = [2, 80], strides = [1, 1]} : vector<10x80xf32> to vector<2x80xf32>
    %c0_53 = arith.constant 0 : index
    %c0_54 = arith.constant 0 : index
    %88 = vector.load %arg5[%c0_53, %c0_54] : memref<400x120xbf16, #tpu.memory_space<vmem>>, vector<80x120xbf16>
    %89 = arith.truncf %87 : vector<2x80xf32> to vector<2x80xbf16>
    %cst_55 = arith.constant dense<0.000000e+00> : vector<2x120xf32>
    %90 = tpu.matmul %89, %88, %cst_55 {dimension_numbers = #tpu.dot_dimension_numbers<[1], [0], [0], [1], [0, 0, 1, 1], [], []>} : vector<2x80xbf16>, vector<80x120xbf16>, vector<2x120xf32> -> vector<2x120xf32>
    %91 = vector.extract_strided_slice %86 {offsets = [2, 0], sizes = [2, 80], strides = [1, 1]} : vector<10x80xf32> to vector<2x80xf32>
    %c80 = arith.constant 80 : index
    %c0_56 = arith.constant 0 : index
    %92 = vector.load %arg5[%c80, %c0_56] : memref<400x120xbf16, #tpu.memory_space<vmem>>, vector<80x120xbf16>
    %93 = arith.truncf %91 : vector<2x80xf32> to vector<2x80xbf16>
    %cst_57 = arith.constant dense<0.000000e+00> : vector<2x120xf32>
    %94 = tpu.matmul %93, %92, %cst_57 {dimension_numbers = #tpu.dot_dimension_numbers<[1], [0], [0], [1], [0, 0, 1, 1], [], []>} : vector<2x80xbf16>, vector<80x120xbf16>, vector<2x120xf32> -> vector<2x120xf32>
    %95 = arith.addf %90, %94 : vector<2x120xf32>
    %96 = vector.extract_strided_slice %86 {offsets = [4, 0], sizes = [2, 80], strides = [1, 1]} : vector<10x80xf32> to vector<2x80xf32>
    %c160 = arith.constant 160 : index
    %c0_58 = arith.constant 0 : index
    %97 = vector.load %arg5[%c160, %c0_58] : memref<400x120xbf16, #tpu.memory_space<vmem>>, vector<80x120xbf16>
    %98 = arith.truncf %96 : vector<2x80xf32> to vector<2x80xbf16>
    %cst_59 = arith.constant dense<0.000000e+00> : vector<2x120xf32>
    %99 = tpu.matmul %98, %97, %cst_59 {dimension_numbers = #tpu.dot_dimension_numbers<[1], [0], [0], [1], [0, 0, 1, 1], [], []>} : vector<2x80xbf16>, vector<80x120xbf16>, vector<2x120xf32> -> vector<2x120xf32>
    %100 = arith.addf %95, %99 : vector<2x120xf32>
    %101 = vector.extract_strided_slice %86 {offsets = [6, 0], sizes = [2, 80], strides = [1, 1]} : vector<10x80xf32> to vector<2x80xf32>
    %c240 = arith.constant 240 : index
    %c0_60 = arith.constant 0 : index
    %102 = vector.load %arg5[%c240, %c0_60] : memref<400x120xbf16, #tpu.memory_space<vmem>>, vector<80x120xbf16>
    %103 = arith.truncf %101 : vector<2x80xf32> to vector<2x80xbf16>
    %cst_61 = arith.constant dense<0.000000e+00> : vector<2x120xf32>
    %104 = tpu.matmul %103, %102, %cst_61 {dimension_numbers = #tpu.dot_dimension_numbers<[1], [0], [0], [1], [0, 0, 1, 1], [], []>} : vector<2x80xbf16>, vector<80x120xbf16>, vector<2x120xf32> -> vector<2x120xf32>
    %105 = arith.addf %100, %104 : vector<2x120xf32>
    %106 = vector.extract_strided_slice %86 {offsets = [8, 0], sizes = [2, 80], strides = [1, 1]} : vector<10x80xf32> to vector<2x80xf32>
    %c320 = arith.constant 320 : index
    %c0_62 = arith.constant 0 : index
    %107 = vector.load %arg5[%c320, %c0_62] : memref<400x120xbf16, #tpu.memory_space<vmem>>, vector<80x120xbf16>
    %108 = arith.truncf %106 : vector<2x80xf32> to vector<2x80xbf16>
    %cst_63 = arith.constant dense<0.000000e+00> : vector<2x120xf32>
    %109 = tpu.matmul %108, %107, %cst_63 {dimension_numbers = #tpu.dot_dimension_numbers<[1], [0], [0], [1], [0, 0, 1, 1], [], []>} : vector<2x80xbf16>, vector<80x120xbf16>, vector<2x120xf32> -> vector<2x120xf32>
    %110 = arith.addf %105, %109 : vector<2x120xf32>
    %c0_64 = arith.constant 0 : index
    %c0_65 = arith.constant 0 : index
    %111 = vector.load %arg6[%c0_64, %c0_65] : memref<1x120xf32, #tpu.memory_space<vmem>>, vector<1x120xf32>
    %112 = vector.broadcast %111 : vector<1x120xf32> to vector<2x120xf32>
    %113 = arith.addf %110, %112 : vector<2x120xf32>
    %cst_66 = arith.constant 0.000000e+00 : f32
    %114 = vector.broadcast %cst_66 : f32 to vector<2x120xf32>
    %115 = arith.maximumf %113, %114 : vector<2x120xf32>
    %c0_67 = arith.constant 0 : index
    %c0_68 = arith.constant 0 : index
    %116 = vector.load %arg7[%c0_67, %c0_68] : memref<120x84xbf16, #tpu.memory_space<vmem>>, vector<120x84xbf16>
    %117 = arith.truncf %115 : vector<2x120xf32> to vector<2x120xbf16>
    %cst_69 = arith.constant dense<0.000000e+00> : vector<2x84xf32>
    %118 = tpu.matmul %117, %116, %cst_69 {dimension_numbers = #tpu.dot_dimension_numbers<[1], [0], [0], [1], [0, 0, 1, 1], [], []>} : vector<2x120xbf16>, vector<120x84xbf16>, vector<2x84xf32> -> vector<2x84xf32>
    %c0_70 = arith.constant 0 : index
    %c0_71 = arith.constant 0 : index
    %119 = vector.load %arg8[%c0_70, %c0_71] : memref<1x84xf32, #tpu.memory_space<vmem>>, vector<1x84xf32>
    %120 = vector.broadcast %119 : vector<1x84xf32> to vector<2x84xf32>
    %121 = arith.addf %118, %120 : vector<2x84xf32>
    %cst_72 = arith.constant 0.000000e+00 : f32
    %122 = vector.broadcast %cst_72 : f32 to vector<2x84xf32>
    %123 = arith.maximumf %121, %122 : vector<2x84xf32>
    %c0_73 = arith.constant 0 : index
    %c0_74 = arith.constant 0 : index
    %124 = vector.load %arg9[%c0_73, %c0_74] : memref<84x10xbf16, #tpu.memory_space<vmem>>, vector<84x10xbf16>
    %125 = arith.truncf %123 : vector<2x84xf32> to vector<2x84xbf16>
    %cst_75 = arith.constant dense<0.000000e+00> : vector<2x10xf32>
    %126 = tpu.matmul %125, %124, %cst_75 {dimension_numbers = #tpu.dot_dimension_numbers<[1], [0], [0], [1], [0, 0, 1, 1], [], []>} : vector<2x84xbf16>, vector<84x10xbf16>, vector<2x10xf32> -> vector<2x10xf32>
    %c0_76 = arith.constant 0 : index
    %c0_77 = arith.constant 0 : index
    %127 = vector.load %arg10[%c0_76, %c0_77] : memref<1x10xf32, #tpu.memory_space<vmem>>, vector<1x10xf32>
    %128 = vector.broadcast %127 : vector<1x10xf32> to vector<2x10xf32>
    %129 = arith.addf %126, %128 : vector<2x10xf32>
    %cst_78 = arith.constant dense<0xFF800000> : vector<2xf32>
    %130 = vector.multi_reduction <maximumf>, %129, %cst_78 [1] : vector<2x10xf32> to vector<2xf32>
    %131 = vector.shape_cast %130 : vector<2xf32> to vector<2x1xf32>
    %132 = vector.broadcast %131 : vector<2x1xf32> to vector<2x10xf32>
    %133 = arith.subf %129, %132 : vector<2x10xf32>
    %134 = math.exp %133 : vector<2x10xf32>
    %cst_79 = arith.constant dense<0.000000e+00> : vector<2xf32>
    %135 = vector.multi_reduction <add>, %134, %cst_79 [1] : vector<2x10xf32> to vector<2xf32>
    %136 = vector.shape_cast %135 : vector<2xf32> to vector<2x1xf32>
    %137 = math.log %136 : vector<2x1xf32>
    %138 = vector.broadcast %137 : vector<2x1xf32> to vector<2x10xf32>
    %139 = arith.subf %133, %138 : vector<2x10xf32>
    %c0_80 = arith.constant 0 : index
    %c0_81 = arith.constant 0 : index
    %140 = vector.load %arg19[%c0_80, %c0_81] : memref<2x10xf32, #tpu.memory_space<vmem>>, vector<2x10xf32>
    tpu.vector_store %arg19[%c0_80, %c0_81], %139 {strides = array<i32>} : memref<2x10xf32, #tpu.memory_space<vmem>>, vector<2x10xf32>,
    return
  }
}

</mosaic_0001>

<bundles_post_ra>
// kernel: lenet5_forward.1
= control target key start
LH: loop header
LB: loop body
LE: loop exit
PB: predicated region body
PF: predicated region fallthrough
CT: control target
= control target key end

     0   :  { %s4577_s0 = inlined_call_operand.vmem [shape: f32[64,28], index: 0, kind: input, shape index: {}]   ;;  %s4578_s1 = inlined_call_operand.vmem [shape: bf16[140,168], index: 1, kind: input, shape index: {}]   ;;  %s4579_s2 = inlined_call_operand.vmem [shape: f32[1,168], index: 2, kind: input, shape index: {}]   ;;  %s4580_s3 = inlined_call_operand.vmem [shape: bf16[420,160], index: 3, kind: input, shape index: {}]   ;;  %s4581_s4 = inlined_call_operand.vmem [shape: f32[1,160], index: 4, kind: input, shape index: {}]   ;;  %s4582_s5 = inlined_call_operand.vmem [shape: bf16[400,120], index: 5, kind: input, shape index: {}]   ;;  %s4583_s6 = inlined_call_operand.vmem [shape: f32[1,120], index: 6, kind: input, shape index: {}]   ;;  %s4584_s7 = inlined_call_operand.vmem [shape: bf16[120,84], index: 7, kind: input, shape index: {}]   ;;  %s4585_s8 = inlined_call_operand.vmem [shape: f32[1,84], index: 8, kind: input, shape index: {}]   ;;  %s4586_s9 = inlined_call_operand.vmem [shape: bf16[84,10], index: 9, kind: input, shape index: {}]   ;;  %s4587_s10 = inlined_call_operand.vmem [shape: f32[1,10], index: 10, kind: input, shape index: {}]   ;;  %s4588_s11 = inlined_call_operand.vmem [shape: bf16[28,56], index: 11, kind: input, shape index: {}]   ;;  %s4589_s12 = inlined_call_operand.vmem [shape: bf16[28,56], index: 12, kind: input, shape index: {}]   ;;  %s4590_s13 = inlined_call_operand.vmem [shape: bf16[168,84], index: 13, kind: input, shape index: {}]   ;;  %s4591_s14 = inlined_call_operand.vmem [shape: bf16[168,84], index: 14, kind: input, shape index: {}]   ;;  %s4592_s15 = inlined_call_operand.vmem [shape: bf16[10,20], index: 15, kind: input, shape index: {}]   ;;  %s4593_s16 = inlined_call_operand.vmem [shape: bf16[10,20], index: 16, kind: input, shape index: {}]   ;;  %s4594_s17 = inlined_call_operand.vmem [shape: bf16[160,80], index: 17, kind: input, shape index: {}]   ;;  %s4595_s18 = inlined_call_operand.vmem [shape: bf16[160,80], index: 18, kind: input, shape index: {}]   ;;  %s4596_s19 = inlined_call_operand.hbm [shape: f32[2,10], index: 19, kind: output, shape index: {}]  }
   0x1   :  { %4600 = sst [smem:[#allocation5_spill]] %s4577_s0 }
   0x2   :  { %4601 = sst [smem:[#allocation6_spill]] %s4578_s1 }
   0x3   :  { %4602 = sst [smem:[#allocation7_spill]] %s4579_s2 }
   0x4   :  { %4603 = sst [smem:[#allocation8_spill]] %s4580_s3 }
   0x5   :  { %s4604_s20 = sld [smem:[#allocation6_spill]]  ;;  %vm113_vm0 = vcmask 1045504   ;;  %vm89_vm1 = vcmask 1046528   ;;  %vm122_vm2 = vcmask 228352  }
   0x6   :  { %s4605_s23 = sld [smem:[#allocation5_spill]] }
   0xb   :  { %v2582_v0 = vld [vmem:[%s4604_s20 + $0x10] sm:$0xf]  ;;  %v3248_v1 = vld [vmem:[%s4604_s20 + $0x14] sm:$0x30]  ;;  %v3247_v4 = vld [vmem:[%s4604_s20 + $0x14] sm:$0xf] }
   0xc   :  { %v64_v2 = vld [vmem:[%s4605_s23] sm:$0xff]  ;;  %v2583_v3 = vor.u32 %v3248_v1, %v2582_v0  ;;  %v2584_v5 = vld [vmem:[%s4604_s20 + $0x18] sm:$0x30]  ;;  %v2558_v6 = vld [vmem:[%s4604_s20 + $0x28] sm:$0xf] }
   0xd   :  { %v2587_v7 = vor.u32 %v3247_v4, %v2584_v5  ;;  %v3252_v8 = vld [vmem:[%s4604_s20 + $0x2c] sm:$0xf0]  ;;  %v3251_v9 = vld [vmem:[%s4604_s20 + $0x2c] sm:$0xf]  ;;  %v2560_v10 = vld [vmem:[%s4604_s20 + $0x30] sm:$0xf0] }
   0xe   :  { %v229_v11 = vsel %vm113_vm0, %v2583_v3, 0  ;;  %v2559_v12 = vor.u32 %v3252_v8, %v2558_v6  ;;  %v2563_v13 = vor.u32 %v3251_v9, %v2560_v10  ;;  %v2574_v14 = vld [vmem:[%s4604_s20] sm:$0xf]  ;;  %v3246_v15 = vld [vmem:[%s4604_s20 + $0x4] sm:$0xf0]  ;;  %v3597_v30 = vld [vmem:[%s4605_s23 + $0x10] sm:$0xff] }
   0xf   :  { %v3570_v16 = vld [vmem:[%s4605_s23 + $0x8] sm:$0xff]  ;;  %240 = vmatpush.bf16.msra.mxu2 %v229_v11  ;;  %v232_v17 = vsel %vm113_vm0, %v2587_v7, 0  ;;  %v3245_v18 = vld [vmem:[%s4604_s20 + $0x4] sm:$0xf]  ;;  %v2575_v23 = vor.u32 %v3246_v15, %v2574_v14  ;;  %v2550_v25 = vld [vmem:[%s4604_s20 + $0x18] sm:$0xc] }
  0x10   :  { %v2576_v19 = vld [vmem:[%s4604_s20 + $0x8] sm:$0xf0]  ;;  %v3580_v20 = vpack.c.bf16 %v3570_v16, %v64_v2  ;;  %268 = vmatpush.bf16.msra.mxu3 %v232_v17  ;;  %v115_v21 = vrot.slane %v2559_v12, 2  ;;  %v118_v22 = vrot.slane %v2563_v13, 2  ;;  %v3250_v26 = vld [vmem:[%s4604_s20 + $0x1c] sm:$0xf0] }
  0x11   :  { %v2579_v24 = vor.u32 %v3245_v18, %v2576_v19  ;;  %v2551_v27 = vor.u32 %v3250_v26, %v2550_v25  ;;  %v3249_v28 = vld [vmem:[%s4604_s20 + $0x1c] sm:$0xc]  ;;  %v2552_v29 = vld [vmem:[%s4604_s20 + $0x20] sm:$0xf0] }
  0x12   :  { %v137_v31 = vsel %vm113_vm0, %v115_v21, 0  ;;  %v140_v32 = vsel %vm113_vm0, %v118_v22, 0  ;;  %v2555_v33 = vor.u32 %v3249_v28, %v2552_v29  ;;  %v3604_v34 = vld [vmem:[%s4605_s23 + $0x18] sm:$0xff]  ;;  %v90_v37 = vrot.slane %v3580_v20, 1 }
  0x13   :  { %148 = vmatpush.bf16.msra.mxu0 %v137_v31  ;;  %176 = vmatpush.bf16.msra.mxu1 %v140_v32  ;;  %v114_v35 = vrot.slane %v2551_v27, 2  ;;  %v3608_v36 = vpack.c.bf16 %v3604_v34, %v3597_v30 }
  0x14   :  { %241 = vmatpush.bf16.msra.mxu2 %v2575_v23  ;;  %269 = vmatpush.bf16.msra.mxu3 %v2579_v24  ;;  %v117_v38 = vrot.slane %v2555_v33, 2 }
  0x15   :  { %v116_v39 = vsel %vm113_vm0, %v114_v35, %v115_v21  ;;  %v91_v40 = vrot.slane %v3608_v36, 1 }
  0x16   :  { %24 = vsyncpa [#allocation3], 0  ;;  %v119_v41 = vsel %vm113_vm0, %v117_v38, %v118_v22  ;;  %v3624_v43 = vld [vmem:[%s4605_s23 + $0x20] sm:$0xff]  ;;  %v3629_v44 = vld [vmem:[%s4605_s23 + $0x28] sm:$0xff]  ;;  %v294_v25 = vrot.slane %v3580_v20, 2  ;;  %v295_v26 = vrot.slane %v3608_v36, 2 }
  0x17   :  { %149 = vmatpush.bf16.msra.mxu0 %v116_v39  ;;  %177 = vmatpush.bf16.msra.mxu1 %v119_v41  ;;  %v92_v42 = vsel %vm89_vm1, %v90_v37, %v91_v40  ;;  %v3633_v45 = vpack.c.bf16 %v3629_v44, %v3624_v43  ;;  %v3646_v48 = vld [vmem:[%s4605_s23 + $0x30] sm:$0xff]  ;;  %v3651_v49 = vld [vmem:[%s4605_s23 + $0x38] sm:$0xff]  ;;  %v2606_v50 = vld [vmem:[%s4604_s20 + $0x48] sm:$0xf]  ;;  %v412_v32 = vrot.slane %v3580_v20, 3  ;;  %v413_v33 = vrot.slane %v3608_v36, 3 }
  0x18   :  { %2588 = vmatmul.msk.bf16.vlgmr.msra.gmra.mxu2 %vm122_vm2, %v3580_v20  ;;  %2592 = vmatmul.msk.bf16.vlgmr.msra.gmra.mxu3 %vm122_vm2, %v3580_v20  ;;  %v3256_v51 = vld [vmem:[%s4604_s20 + $0x4c] sm:$0x30]  ;;  %v3255_v52 = vld [vmem:[%s4604_s20 + $0x4c] sm:$0xf]  ;;  %v2608_v54 = vld [vmem:[%s4604_s20 + $0x50] sm:$0x30]  ;;  %v84_v7 = vpack.c.bf16 %v3651_v49, %v3646_v48  ;;  %v296_v27 = vsel %vm113_vm0, %v294_v25, %v295_v26  ;;  %v79_v28 = vpack.c.bf16 %v3646_v48, %v3646_v48 }
  0x19   :  { %v93_v46 = vrot.slane %v3633_v45, 1  ;;  %v2607_v53 = vor.u32 %v3256_v51, %v2606_v50  ;;  %v2630_v55 = vld [vmem:[%s4604_s20 + $0x60] sm:$0xf]  ;;  %v3260_v56 = vld [vmem:[%s4604_s20 + $0x64] sm:$0xf0]  ;;  %v2611_v57 = vor.u32 %v3255_v52, %v2608_v54  ;;  %v297_v29 = vrot.slane %v3633_v45, 2 }
  0x1a   :  { %2564 = vmatmul.msk.bf16.vlgmr.msra.gmra.mxu0 %vm122_vm2, %v92_v42  ;;  %2568 = vmatmul.msk.bf16.vlgmr.msra.gmra.mxu1 %vm122_vm2, %v92_v42  ;;  %v2631_v58 = vor.u32 %v3260_v56, %v2630_v55  ;;  %v3259_v59 = vld [vmem:[%s4604_s20 + $0x64] sm:$0xf]  ;;  %v2632_v60 = vld [vmem:[%s4604_s20 + $0x68] sm:$0xf0]  ;;  %v2622_v61 = vld [vmem:[%s4604_s20 + $0x50] sm:$0xc] }
  0x1b   :  { %v94_v47 = vsel %vm89_vm1, %v91_v40, %v93_v46  ;;  %v332_v62 = vsel %vm113_vm0, %v2607_v53, 0  ;;  %v2635_v63 = vor.u32 %v3259_v59, %v2632_v60  ;;  %v3258_v0 = vld [vmem:[%s4604_s20 + $0x54] sm:$0xf0]  ;;  %v3257_v1 = vld [vmem:[%s4604_s20 + $0x54] sm:$0xc]  ;;  %v335_v2 = vsel %vm113_vm0, %v2611_v57, 0 }
  0x1c   :  { %343 = vmatpush.bf16.msrb.mxu0 %v332_v62  ;;  %v436_v3 = vrot.slane %v2631_v58, 2  ;;  %v2623_v4 = vor.u32 %v3258_v0, %v2622_v61  ;;  %v2624_v5 = vld [vmem:[%s4604_s20 + $0x58] sm:$0xf0]  ;;  %v2598_v6 = vld [vmem:[%s4604_s20 + $0x38] sm:$0xf]  ;;  %371 = vmatpush.bf16.msrb.mxu1 %v335_v2  ;;  %v95_v22 = vrot.slane %v84_v7, 1  ;;  %v298_v31 = vsel %vm113_vm0, %v295_v26, %v297_v29 }
  0x1d   :  { %v439_v8 = vrot.slane %v2635_v63, 2  ;;  %v2627_v9 = vor.u32 %v3257_v1, %v2624_v5  ;;  %v3254_v10 = vld [vmem:[%s4604_s20 + $0x3c] sm:$0xf0]  ;;  %v3253_v11 = vld [vmem:[%s4604_s20 + $0x3c] sm:$0xf]  ;;  %vm411_vm3 = vcmask 1044480   ;;  %v535_v59 = vpack.c.bf16 %v3597_v30, %v3570_v16 }
  0x1e   :  { %v456_v12 = vsel %vm113_vm0, %v436_v3, 0  ;;  %v435_v13 = vrot.slane %v2623_v4, 2  ;;  %v2599_v14 = vor.u32 %v3254_v10, %v2598_v6  ;;  %v2600_v15 = vld [vmem:[%s4604_s20 + $0x40] sm:$0xf0]  ;;  %v96_v24 = vsel %vm89_vm1, %v93_v46, %v95_v22  ;;  %v3264_v40 = vld [vmem:[%s4604_s20 + $0x84] sm:$0x30] }
  0x1f   :  { %467 = vmatpush.bf16.msrb.mxu2 %v456_v12  ;;  %v459_v17 = vsel %vm113_vm0, %v439_v8, 0  ;;  %v438_v18 = vrot.slane %v2627_v9, 2  ;;  %v2603_v19 = vor.u32 %v3253_v11, %v2600_v15  ;;  %v414_v35 = vsel %vm411_vm3, %v412_v32, %v413_v33  ;;  %v3263_v41 = vld [vmem:[%s4604_s20 + $0x84] sm:$0xf]  ;;  %v2646_v52 = vld [vmem:[%s4604_s20 + $0x70] sm:$0xf] }
  0x20   :  { %495 = vmatpush.bf16.msrb.mxu3 %v459_v17  ;;  %v437_v21 = vsel %vm113_vm0, %v435_v13, %v436_v3  ;;  %344 = vmatpush.bf16.msrb.mxu0 %v2599_v14  ;;  %v299_v37 = vrot.slane %v84_v7, 2  ;;  %v415_v39 = vrot.slane %v3633_v45, 3  ;;  %v417_v51 = vrot.slane %v84_v7, 3  ;;  %v3262_v53 = vld [vmem:[%s4604_s20 + $0x74] sm:$0xf0]  ;;  %s4606_s1 = sld [smem:[#allocation7_spill]] }
  0x21   :  { %v440_v23 = vsel %vm113_vm0, %v438_v18, %v439_v8  ;;  %372 = vmatpush.bf16.msrb.mxu1 %v2603_v19  ;;  %v3261_v54 = vld [vmem:[%s4604_s20 + $0x74] sm:$0xf]  ;;  %v2647_v56 = vor.u32 %v3262_v53, %v2646_v52  ;;  %v2648_v57 = vld [vmem:[%s4604_s20 + $0x78] sm:$0xf0]  ;;  %v536_v16 = vpack.c.bf16 %v3624_v43, %v3604_v34  ;;  %v537_v34 = vpack.c.bf16 %v3646_v48, %v3629_v44  ;;  %s4607_s27 = sld [smem:[#allocation8_spill]]  ;;  %s2539_s28 = sshll.u32 %s4596_s19, 4  ;;  %s2540_s28 = int_to_ptr.hbm [resolvable:$true] %s2539_s28 }
  0x22   :  { %v300_v38 = vsel %vm113_vm0, %v297_v29, %v299_v37  ;;  %v416_v20 = vsel %vm411_vm3, %v413_v33, %v415_v39  ;;  %v418_v55 = vsel %vm411_vm3, %v415_v39, %v417_v51  ;;  %v2651_v58 = vor.u32 %v3261_v54, %v2648_v57 }
  0x23   :  { %468 = vmatpush.bf16.msrb.mxu2 %v437_v21  ;;  %v538_v44 = vpack.c.bf16 %v3651_v49, %v3651_v49  ;;  %vm708_vm4 = vcmask 1043456   ;;  %vm701_vm5 = vcmask 457728   ;;  %vm1197_vm6 = vcmask 1041408  }
  0x24   :  { %496 = vmatpush.bf16.msrb.mxu3 %v440_v23  ;;  %vm907_vm7 = vcmask 326656   ;;  %vm1190_vm8 = vcmask 687104   ;;  %vm1764_vm9 = vcmask 162816   ;;  %vm1926_vm10 = vcmask 261120  }
  0x25   :  { %vm2121_vm11 = vcmask 654336   ;;  %vm2429_vm12 = vcmask 982016   ;;  %vm2518_vm13 = vcmask 74752  }
  0x28   :  { %2589 = vmatmul.msk.bf16.gmra.mxu2 %vm122_vm2, %v3608_v36  ;;  %2593 = vmatmul.msk.bf16.gmra.mxu3 %vm122_vm2, %v3608_v36  ;;  %v2654_v36 = vld [vmem:[%s4604_s20 + $0x80] sm:$0xf] }
  0x29   :  { %v2655_v42 = vor.u32 %v3264_v40, %v2654_v36 }
  0x2a   :  { %2565 = vmatmul.msk.bf16.gmra.mxu0 %vm122_vm2, %v94_v47  ;;  %2569 = vmatmul.msk.bf16.gmra.mxu1 %vm122_vm2, %v94_v47 }
  0x2b   :  { %v570_v47 = vsel %vm113_vm0, %v2655_v42, 0 }
  0x2c   :  { %581 = vmatpush.bf16.msra.mxu0 %v570_v47 }
  0x30   :  { %582 = vmatpush.bf16.msra.mxu0 %v2647_v56 }
  0x38   :  { %2590 = vmatmul.msk.bf16.gmra.mxu2 %vm122_vm2, %v3633_v45  ;;  %2594 = vmatmul.msk.bf16.gmra.mxu3 %vm122_vm2, %v3633_v45  ;;  %v2656_v45 = vld [vmem:[%s4604_s20 + $0x88] sm:$0x30] }
  0x39   :  { %v2659_v46 = vor.u32 %v3263_v41, %v2656_v45 }
  0x3a   :  { %2566 = vmatmul.msk.bf16.gmra.mxu0 %vm122_vm2, %v96_v24  ;;  %2570 = vmatmul.msk.bf16.gmra.mxu1 %vm122_vm2, %v96_v24 }
  0x3b   :  { %v573_v50 = vsel %vm113_vm0, %v2659_v46, 0 }
  0x3c   :  { %609 = vmatpush.bf16.msra.mxu1 %v573_v50 }
  0x40   :  { %610 = vmatpush.bf16.msra.mxu1 %v2651_v58 }
  0x48   :  { %2591 = vmatmul.msk.bf16.gmra.mxu2 %vm122_vm2, %v79_v28  ;;  %2595 = vmatmul.msk.bf16.gmra.mxu3 %vm122_vm2, %v79_v28 }
  0x4a   :  { %2567 = vmatmul.msk.bf16.gmra.mxu0 %vm122_vm2, %v95_v22  ;;  %2571 = vmatmul.msk.bf16.gmra.mxu1 %vm122_vm2, %v95_v22 }
  0x58   :  { %2636 = vmatmul.msk.bf16.vlgmr.msrb.gmra.mxu2 %vm122_vm2, %v414_v35  ;;  %2640 = vmatmul.msk.bf16.vlgmr.msrb.gmra.mxu3 %vm122_vm2, %v414_v35 }
  0x5a   :  { %2612 = vmatmul.msk.bf16.vlgmr.msrb.gmra.mxu0 %vm122_vm2, %v296_v27  ;;  %2616 = vmatmul.msk.bf16.vlgmr.msrb.gmra.mxu1 %vm122_vm2, %v296_v27 }
  0x68   :  { %2637 = vmatmul.msk.bf16.gmra.mxu2 %vm122_vm2, %v416_v20  ;;  %2641 = vmatmul.msk.bf16.gmra.mxu3 %vm122_vm2, %v416_v20 }
  0x6a   :  { %2613 = vmatmul.msk.bf16.gmra.mxu0 %vm122_vm2, %v298_v31  ;;  %2617 = vmatmul.msk.bf16.gmra.mxu1 %vm122_vm2, %v298_v31 }
  0x78   :  { %2638 = vmatmul.msk.bf16.gmra.mxu2 %vm122_vm2, %v418_v55  ;;  %2642 = vmatmul.msk.bf16.gmra.mxu3 %vm122_vm2, %v418_v55 }
  0x7a   :  { %2614 = vmatmul.msk.bf16.gmra.mxu0 %vm122_vm2, %v300_v38  ;;  %2618 = vmatmul.msk.bf16.gmra.mxu1 %vm122_vm2, %v300_v38 }
  0x88   :  { %2639 = vmatmul.msk.bf16.gmra.mxu2 %vm122_vm2, %v417_v51  ;;  %2643 = vmatmul.msk.bf16.gmra.mxu3 %vm122_vm2, %v417_v51 }
  0x8a   :  { %2615 = vmatmul.msk.bf16.gmra.mxu0 %vm122_vm2, %v299_v37  ;;  %2619 = vmatmul.msk.bf16.gmra.mxu1 %vm122_vm2, %v299_v37 }
  0x97   :  { %v151_v60 = vpop.f32.mrf.mxu0  ;;  %v179_v61 = vpop.f32.mrf.mxu1 }
  0x9a   :  { %2660 = vmatmul.msk.bf16.vlgmr.msra.gmra.mxu0 %vm122_vm2, %v535_v59  ;;  %2664 = vmatmul.msk.bf16.vlgmr.msra.gmra.mxu1 %vm122_vm2, %v535_v59 }
  0x9b   :  { %v243_v62 = vpop.f32.mrf.mxu2  ;;  %v271_v63 = vpop.f32.mrf.mxu3 }
  0x9c   :  { %v244_v0 = vadd.f32 %v243_v62, %v151_v60  ;;  %v272_v1 = vadd.f32 %v271_v63, %v179_v61 }
  0x9f   :  { %v3780_v2 = vpop.f32.mrf.mxu0  ;;  %v3782_v3 = vpop.f32.mrf.mxu1 }
  0xa3   :  { %v3784_v4 = vpop.f32.mrf.mxu2  ;;  %v3786_v5 = vpop.f32.mrf.mxu3 }
  0xa7   :  { %v156_v30 = vpop.f32.mrf.mxu0  ;;  %v184_v6 = vpop.f32.mrf.mxu1 }
  0xaa   :  { %2661 = vmatmul.msk.bf16.gmra.mxu0 %vm122_vm2, %v536_v16  ;;  %2665 = vmatmul.msk.bf16.gmra.mxu1 %vm122_vm2, %v536_v16 }
  0xab   :  { %v248_v7 = vpop.f32.mrf.mxu2  ;;  %v276_v8 = vpop.f32.mrf.mxu3 }
  0xac   :  { %v249_v9 = vadd.f32 %v248_v7, %v156_v30  ;;  %v277_v10 = vadd.f32 %v276_v8, %v184_v6 }
  0xaf   :  { %v3792_v11 = vpop.f32.mrf.mxu0  ;;  %v3794_v12 = vpop.f32.mrf.mxu1 }
  0xb3   :  { %v3796_v13 = vpop.f32.mrf.mxu2  ;;  %v3798_v14 = vpop.f32.mrf.mxu3 }
  0xb7   :  { %v161_v43 = vpop.f32.mrf.mxu0  ;;  %v189_v15 = vpop.f32.mrf.mxu1 }
  0xba   :  { %2662 = vmatmul.msk.bf16.gmra.mxu0 %vm122_vm2, %v537_v34  ;;  %2666 = vmatmul.msk.bf16.gmra.mxu1 %vm122_vm2, %v537_v34 }
  0xbb   :  { %v253_v17 = vpop.f32.mrf.mxu2  ;;  %v281_v18 = vpop.f32.mrf.mxu3 }
  0xbc   :  { %v254_v19 = vadd.f32 %v253_v17, %v161_v43  ;;  %v282_v21 = vadd.f32 %v281_v18, %v189_v15 }
  0xbf   :  { %v3804_v22 = vpop.f32.mrf.mxu0  ;;  %v3806_v23 = vpop.f32.mrf.mxu1 }
  0xc3   :  { %v3808_v24 = vpop.f32.mrf.mxu2  ;;  %v3810_v25 = vpop.f32.mrf.mxu3 }
  0xc7   :  { %v166_v48 = vpop.f32.mrf.mxu0  ;;  %v194_v26 = vpop.f32.mrf.mxu1 }
  0xca   :  { %2663 = vmatmul.msk.bf16.gmra.mxu0 %vm122_vm2, %v538_v44  ;;  %2667 = vmatmul.msk.bf16.gmra.mxu1 %vm122_vm2, %v538_v44 }
  0xcb   :  { %v258_v27 = vpop.f32.mrf.mxu2  ;;  %v286_v28 = vpop.f32.mrf.mxu3 }
  0xcc   :  { %v3816_v29 = vadd.f32 %v258_v27, %v166_v48  ;;  %v3818_v31 = vadd.f32 %v286_v28, %v194_v26 }
  0xcf   :  { %v168_v32 = vpop.f32.mrf.mxu0  ;;  %v196_v33 = vpop.f32.mrf.mxu1 }
  0xd3   :  { %v260_v35 = vpop.f32.mrf.mxu2  ;;  %v288_v37 = vpop.f32.mrf.mxu3 }
  0xd7   :  { %v346_v38 = vpop.f32.mrf.mxu0  ;;  %v374_v39 = vpop.f32.mrf.mxu1 }
  0xd8   :  { %v393_v20 = vadd.f32 %v346_v38, %v244_v0  ;;  %v394_v49 = vadd.f32 %v374_v39, %v272_v1 }
  0xdb   :  { %v470_v36 = vpop.f32.mrf.mxu2  ;;  %v498_v40 = vpop.f32.mrf.mxu3 }
  0xdc   :  { %v3820_v41 = vadd.f32 %v470_v36, %v393_v20  ;;  %v3822_v42 = vadd.f32 %v498_v40, %v394_v49 }
  0xdf   :  { %v348_v45 = vpop.f32.mrf.mxu0  ;;  %v3824_v46 = vpop.f32.mrf.mxu1 }
  0xe3   :  { %v3826_v47 = vpop.f32.mrf.mxu2  ;;  %v3828_v50 = vpop.f32.mrf.mxu3 }
  0xe7   :  { %v351_v51 = vpop.f32.mrf.mxu0  ;;  %v379_v52 = vpop.f32.mrf.mxu1 }
  0xe8   :  { %v397_v53 = vadd.f32 %v351_v51, %v249_v9  ;;  %v398_v54 = vadd.f32 %v379_v52, %v277_v10  ;;  %v256_v51 = vadd.f32 %v3808_v24, %v3804_v22  ;;  %v284_v52 = vadd.f32 %v3810_v25, %v3806_v23  ;;  %v645_v23 = vld [vmem:[%s4606_s1] sm:$0x3] }
  0xe9   :  { %v274_v24 = vadd.f32 %v3786_v5, %v3782_v3 }
  0xeb   :  { %v475_v55 = vpop.f32.mrf.mxu2  ;;  %v503_v56 = vpop.f32.mrf.mxu3 }
  0xec   :  { %v3830_v57 = vadd.f32 %v475_v55, %v397_v53  ;;  %v3832_v58 = vadd.f32 %v503_v56, %v398_v54  ;;  %v246_v55 = vadd.f32 %v3784_v4, %v3780_v2 }
  0xee   :  { %v395_v2 = vadd.f32 %v348_v45, %v246_v55 }
  0xef   :  { %v353_v59 = vpop.f32.mrf.mxu0  ;;  %v381_v60 = vpop.f32.mrf.mxu1 }
  0xf0   :  { %v519_v3 = vadd.f32 %v3826_v47, %v395_v2 }
  0xf3   :  { %v477_v61 = vpop.f32.mrf.mxu2  ;;  %v505_v62 = vpop.f32.mrf.mxu3 }
  0xf7   :  { %v356_v63 = vpop.f32.mrf.mxu0  ;;  %v384_v0 = vpop.f32.mrf.mxu1 }
  0xf8   :  { %v401_v1 = vadd.f32 %v356_v63, %v254_v19  ;;  %v402_v16 = vadd.f32 %v384_v0, %v282_v21  ;;  %v251_v0 = vadd.f32 %v3796_v13, %v3792_v11 }
  0xfb   :  { %v480_v30 = vpop.f32.mrf.mxu2  ;;  %v508_v6 = vpop.f32.mrf.mxu3 }
  0xfc   :  { %v525_v7 = vadd.f32 %v480_v30, %v401_v1  ;;  %v526_v8 = vadd.f32 %v508_v6, %v402_v16  ;;  %v279_v1 = vadd.f32 %v3798_v14, %v3794_v12  ;;  %v648_v12 = vperm.slane %v645_v23, 1 }
  0xff   :  { %v358_v9 = vpop.f32.mrf.mxu0  ;;  %v386_v10 = vpop.f32.mrf.mxu1 }
 0x100   :  { %v403_v53 = vadd.f32 %v358_v9, %v256_v51  ;;  %v404_v54 = vadd.f32 %v386_v10, %v284_v52  ;;  %v647_v9 = vperm.slane %v645_v23, 0 }
 0x103   :  { %v482_v34 = vpop.f32.mrf.mxu2  ;;  %v510_v43 = vpop.f32.mrf.mxu3 }
 0x104   :  { %v527_v16 = vadd.f32 %v482_v34, %v403_v53  ;;  %v528_v22 = vadd.f32 %v510_v43, %v404_v54 }
 0x107   :  { %v361_v15 = vpop.f32.mrf.mxu0  ;;  %v389_v17 = vpop.f32.mrf.mxu1 }
 0x108   :  { %v405_v56 = vadd.f32 %v361_v15, %v3816_v29  ;;  %v406_v63 = vadd.f32 %v389_v17, %v3818_v31  ;;  %v399_v29 = vadd.f32 %v353_v59, %v251_v0  ;;  %v400_v31 = vadd.f32 %v381_v60, %v279_v1 }
 0x10a   :  { %v523_v34 = vadd.f32 %v477_v61, %v399_v29  ;;  %v524_v43 = vadd.f32 %v505_v62, %v400_v31  ;;  %v3265_v31 = vld [vmem:[%s4588_s11] sm:$0xff] }
 0x10b   :  { %v485_v18 = vpop.f32.mrf.mxu2  ;;  %v513_v44 = vpop.f32.mrf.mxu3 }
 0x10c   :  { %v529_v4 = vadd.f32 %v485_v18, %v405_v56  ;;  %v530_v25 = vadd.f32 %v513_v44, %v406_v63 }
 0x10f   :  { %v363_v48 = vpop.f32.mrf.mxu0  ;;  %v391_v26 = vpop.f32.mrf.mxu1 }
 0x110   :  { %v396_v48 = vadd.f32 %v3824_v46, %v274_v24 }
 0x112   :  { %v520_v26 = vadd.f32 %v3828_v50, %v396_v48  ;;  %v3284_v48 = vld [vmem:[%s4591_s14 + $0x28] sm:$0xff] }
 0x113   :  { %v487_v27 = vpop.f32.mrf.mxu2  ;;  %v515_v28 = vpop.f32.mrf.mxu3 }
 0x117   :  { %v3834_v32 = vpop.f32.mrf.mxu0  ;;  %v3836_v19 = vpop.f32.mrf.mxu1 }
 0x118   :  { %v631_v50 = vadd.f32 %v3834_v32, %v3820_v41 }
 0x11a   :  { %v651_v41 = vadd.f32 %v647_v9, %v631_v50  ;;  %v3279_v50 = vld [vmem:[%s4591_s14] sm:$0xff] }
 0x11c   :  { %v665_v2 = vmax.f32 %v651_v41, 0.0 }
 0x11f   :  { %v586_v21 = vpop.f32.mrf.mxu0  ;;  %v614_v33 = vpop.f32.mrf.mxu1 }
 0x120   :  { %v633_v46 = vadd.f32 %v586_v21, %v519_v3  ;;  %v3273_v3 = vld [vmem:[%s4590_s13 + $0x20] sm:$0xff] }
 0x122   :  { %v653_v54 = vadd.f32 %v647_v9, %v633_v46 }
 0x127   :  { %v589_v35 = vpop.f32.mrf.mxu0  ;;  %v617_v37 = vpop.f32.mrf.mxu1 }
 0x128   :  { %v635_v27 = vadd.f32 %v589_v35, %v3830_v57  ;;  %v636_v61 = vadd.f32 %v617_v37, %v3832_v58  ;;  %v632_v57 = vadd.f32 %v3836_v19, %v3822_v42  ;;  %v667_v19 = vmax.f32 %v653_v54, 0.0 }
 0x12a   :  { %v655_v21 = vadd.f32 %v647_v9, %v635_v27  ;;  %v652_v32 = vadd.f32 %v648_v12, %v632_v57  ;;  %v3287_v57 = vld [vmem:[%s4591_s14 + $0x40] sm:$0xff] }
 0x12f   :  { %v591_v38 = vpop.f32.mrf.mxu0  ;;  %v619_v39 = vpop.f32.mrf.mxu1 }
 0x130   :  { %v637_v59 = vadd.f32 %v591_v38, %v523_v34  ;;  %v638_v60 = vadd.f32 %v619_v39, %v524_v43  ;;  %v3286_v34 = vld [vmem:[%s4591_s14 + $0x38] sm:$0xff]  ;;  %v3275_v43 = vld [vmem:[%s4590_s13 + $0x30] sm:$0xff] }
 0x132   :  { %v658_v38 = vadd.f32 %v648_v12, %v638_v60  ;;  %v839_v60 = vld [vmem:[%s4590_s13 + $0x50] sm:$0xf] }
 0x134   :  { %v672_v63 = vmax.f32 %v658_v38, 0.0  ;;  %v3288_v38 = vld [vmem:[%s4591_s14 + $0x48] sm:$0xff] }
 0x137   :  { %v594_v20 = vpop.f32.mrf.mxu0  ;;  %v622_v49 = vpop.f32.mrf.mxu1 }
 0x138   :  { %v639_v15 = vadd.f32 %v594_v20, %v525_v7  ;;  %v640_v17 = vadd.f32 %v622_v49, %v526_v8  ;;  %v634_v8 = vadd.f32 %v614_v33, %v520_v26  ;;  %v657_v49 = vadd.f32 %v647_v9, %v637_v59  ;;  %v3282_v59 = vld [vmem:[%s4591_s14 + $0x18] sm:$0xff] }
 0x139   :  { %v656_v33 = vadd.f32 %v648_v12, %v636_v61 }
 0x13a   :  { %v659_v62 = vadd.f32 %v647_v9, %v639_v15  ;;  %v660_v7 = vadd.f32 %v648_v12, %v640_v17  ;;  %v654_v55 = vadd.f32 %v648_v12, %v634_v8  ;;  %v671_v56 = vmax.f32 %v657_v49, 0.0  ;;  %v3285_v15 = vld [vmem:[%s4591_s14 + $0x30] sm:$0xff]  ;;  %v3274_v17 = vld [vmem:[%s4590_s13 + $0x28] sm:$0xff] }
 0x13b   :  { %v670_v42 = vmax.f32 %v656_v33, 0.0  ;;  %v3280_v49 = vld [vmem:[%s4591_s14 + $0x8] sm:$0xff] }
 0x13c   :  { %v673_v37 = vmax.f32 %v659_v62, 0.0  ;;  %v674_v53 = vmax.f32 %v660_v7, 0.0  ;;  %v3271_v62 = vld [vmem:[%s4590_s13 + $0x10] sm:$0xff] }
 0x13d   :  { %v686_v24 = vpack.c.bf16 %v672_v63, %v670_v42  ;;  %v3281_v7 = vld [vmem:[%s4591_s14 + $0x10] sm:$0xff] }
 0x13f   :  { %v596_v36 = vpop.f32.mrf.mxu0  ;;  %v624_v40 = vpop.f32.mrf.mxu1 }
 0x140   :  { %v641_v30 = vadd.f32 %v596_v36, %v527_v16  ;;  %v642_v6 = vadd.f32 %v624_v40, %v528_v22  ;;  %v669_v16 = vmax.f32 %v655_v21, 0.0  ;;  %v668_v22 = vmax.f32 %v654_v55, 0.0 }
 0x142   :  { %v661_v18 = vadd.f32 %v647_v9, %v641_v30  ;;  %v662_v44 = vadd.f32 %v648_v12, %v642_v6  ;;  %v685_v23 = vpack.c.bf16 %v671_v56, %v669_v16  ;;  %v2674_v30 = vld [vmem:[%s4588_s11 + $0x8] sm:$0xf]  ;;  %v3266_v6 = vld [vmem:[%s4588_s11 + $0x8] sm:$0x30] }
 0x144   :  { %v675_v39 = vmax.f32 %v661_v18, 0.0  ;;  %v676_v40 = vmax.f32 %v662_v44, 0.0  ;;  %v975_v18 = vld [vmem:[%s4591_s14 + $0x50] sm:$0xf]  ;;  %v885_v44 = vunpack.c.l.b16 %v839_v60  ;;  %v3295_v60 = vld [vmem:[%s4607_s27 + $0x34] sm:$0xf] }
 0x145   :  { %v1017_v26 = vunpack.c.l.b16 %v975_v18 }
 0x146   :  { %v687_v0 = vpack.c.bf16 %v675_v39, %v673_v37  ;;  %v688_v1 = vpack.c.bf16 %v676_v40, %v674_v53  ;;  %v896_v27 = vpack.c.b16 %v885_v44, %v885_v44  ;;  %v1094_v37 = vld [vmem:[%s4607_s27 + $0x50] sm:$0x33]  ;;  %v2848_v44 = vld [vmem:[%s4607_s27 + $0x38] sm:$0xf0] }
 0x147   :  { %v599_v11 = vpop.f32.mrf.mxu0  ;;  %v627_v13 = vpop.f32.mrf.mxu1  ;;  %v1271_v53 = vunpack.c.l.b16 %v1094_v37  ;;  %v1272_v54 = vunpack.c.h.b16 %v1094_v37 }
 0x148   :  { %v643_v14 = vadd.f32 %v599_v11, %v529_v4  ;;  %v644_v10 = vadd.f32 %v627_v13, %v530_v25  ;;  %v666_v4 = vmax.f32 %v652_v32, 0.0  ;;  %v683_v25 = vpack.c.bf16 %v667_v19, %v665_v2  ;;  %v3267_v13 = vld [vmem:[%s4589_s12] sm:$0xff] }
 0x149   :  { %v2675_v11 = vor.u32 %v3266_v6, %v2674_v30  ;;  %v915_v46 = vsel %vm708_vm4, %v896_v27, 0  ;;  %v1283_v63 = vpack.c.b16 %v1271_v53, %v1271_v53 }
 0x14a   :  { %v663_v5 = vadd.f32 %v647_v9, %v643_v14  ;;  %v664_v45 = vadd.f32 %v648_v12, %v644_v10  ;;  %v684_v29 = vpack.c.bf16 %v668_v22, %v666_v4  ;;  %v2686_v9 = vld [vmem:[%s4589_s12 + $0x8] sm:$0xf]  ;;  %v3268_v12 = vld [vmem:[%s4589_s12 + $0x8] sm:$0x30]  ;;  %v3276_v10 = vld [vmem:[%s4590_s13 + $0x38] sm:$0xff]  ;;  %941 = vmatpush.bf16.msrb.mxu1 %v915_v46 }
 0x14b   :  { %v2687_v14 = vor.u32 %v3268_v12, %v2686_v9  ;;  %917 = vmatpush.bf16.msrb.mxu0 %v3276_v10  ;;  %v3298_v10 = vld [vmem:[%s4607_s27 + $0x44] sm:$0xf0]  ;;  %v3293_v46 = vld [vmem:[%s4607_s27 + $0x24] sm:$0xf] }
 0x14c   :  { %v677_v28 = vmax.f32 %v663_v5, 0.0  ;;  %v678_v36 = vmax.f32 %v664_v45, 0.0  ;;  %v3283_v5 = vld [vmem:[%s4591_s14 + $0x20] sm:$0xff]  ;;  %v3272_v45 = vld [vmem:[%s4590_s13 + $0x18] sm:$0xff] }
 0x14e   :  { %v689_v47 = vpack.c.bf16 %v677_v28, %v677_v28  ;;  %v690_v20 = vpack.c.bf16 %v678_v36, %v678_v36  ;;  %v1028_v28 = vpack.c.b16 %v1017_v26, %v1017_v26 }
 0x14f   :  { %v601_v51 = vpop.f32.mrf.mxu0  ;;  %v629_v52 = vpop.f32.mrf.mxu1  ;;  %918 = vmatpush.bf16.msrb.mxu0 %v3275_v43 }
 0x150   :  { %v710_v58 = vsel %vm708_vm4, %v689_v47, 0  ;;  %v713_v35 = vsel %vm708_vm4, %v690_v20, 0  ;;  %v1040_v8 = vsel %vm708_vm4, %v1028_v28, 0  ;;  %v3270_v47 = vld [vmem:[%s4590_s13 + $0x8] sm:$0xff]  ;;  %v3269_v51 = vld [vmem:[%s4590_s13] sm:$0xff]  ;;  %v2851_v28 = vor.u32 %v3295_v60, %v2848_v44 }
 0x151   :  { %719 = vmatpush.bf16.msra.mxu2 %v710_v58  ;;  %738 = vmatpush.bf16.msra.mxu3 %v713_v35  ;;  %v3278_v20 = vld [vmem:[%s4590_s13 + $0x48] sm:$0xff]  ;;  %v3277_v52 = vld [vmem:[%s4590_s13 + $0x40] sm:$0xff] }
 0x152   :  { %942 = vmatpush.bf16.msrb.mxu1 %v3278_v20 }
 0x153   :  { %919 = vmatpush.bf16.msrb.mxu0 %v3274_v17 }
 0x155   :  { %720 = vmatpush.bf16.msra.mxu2 %v687_v0  ;;  %739 = vmatpush.bf16.msra.mxu3 %v688_v1 }
 0x156   :  { %943 = vmatpush.bf16.msrb.mxu1 %v3277_v52  ;;  %v2812_v52 = vld [vmem:[%s4607_s27 + $0x98] sm:$0xf0] }
 0x157   :  { %920 = vmatpush.bf16.msrb.mxu0 %v3273_v3 }
 0x159   :  { %721 = vmatpush.bf16.msra.mxu2 %v685_v23  ;;  %740 = vmatpush.bf16.msra.mxu3 %v686_v24 }
 0x15b   :  { %921 = vmatpush.bf16.msrb.mxu0 %v3272_v45  ;;  %v2846_v45 = vld [vmem:[%s4607_s27 + $0x30] sm:$0xf] }
 0x15d   :  { %722 = vmatpush.bf16.msra.mxu2 %v683_v25  ;;  %741 = vmatpush.bf16.msra.mxu3 %v684_v29 }
 0x15f   :  { %922 = vmatpush.bf16.msrb.mxu0 %v3271_v62  ;;  %v2838_v62 = vld [vmem:[%s4607_s27 + $0x20] sm:$0xf] }
 0x160   :  { %2676 = vmatmul.msk.bf16.vlgmr.msra.gmra.mxu2 %vm701_vm5, %v3265_v31  ;;  %2678 = vmatmul.msk.bf16.vlgmr.msra.gmra.mxu3 %vm701_vm5, %v3265_v31 }
 0x161   :  { %777 = vmatpush.bf16.msrb.mxu2 %v710_v58  ;;  %796 = vmatpush.bf16.msrb.mxu3 %v713_v35 }
 0x163   :  { %923 = vmatpush.bf16.msrb.mxu0 %v3270_v47 }
 0x165   :  { %778 = vmatpush.bf16.msrb.mxu2 %v687_v0  ;;  %797 = vmatpush.bf16.msrb.mxu3 %v688_v1  ;;  %v1284_v0 = vpack.c.b16 %v1272_v54, %v1272_v54  ;;  %v1302_v1 = vsel %vm1197_vm6, %v1283_v63, 0  ;;  %v2832_v54 = vld [vmem:[%s4607_s27 + $0x18] sm:$0xf0]  ;;  %v3306_v63 = vld [vmem:[%s4607_s27 + $0x84] sm:$0xf0] }
 0x167   :  { %924 = vmatpush.bf16.msrb.mxu0 %v3269_v51  ;;  %v1305_v41 = vsel %vm1197_vm6, %v1284_v0, 0  ;;  %v3307_v51 = vld [vmem:[%s4607_s27 + $0x94] sm:$0xf]  ;;  %v3305_v0 = vld [vmem:[%s4607_s27 + $0x84] sm:$0xf] }
 0x169   :  { %779 = vmatpush.bf16.msrb.mxu2 %v685_v23  ;;  %798 = vmatpush.bf16.msrb.mxu3 %v686_v24 }
 0x16d   :  { %780 = vmatpush.bf16.msrb.mxu2 %v683_v25  ;;  %799 = vmatpush.bf16.msrb.mxu3 %v684_v29 }
 0x170   :  { %2677 = vmatmul.msk.bf16.gmra.mxu2 %vm701_vm5, %v2675_v11  ;;  %2679 = vmatmul.msk.bf16.gmra.mxu3 %vm701_vm5, %v2675_v11 }
 0x171   :  { %1042 = vmatpush.bf16.msra.mxu2 %v3286_v34  ;;  %1066 = vmatpush.bf16.msra.mxu3 %v1040_v8  ;;  %v3297_v34 = vld [vmem:[%s4607_s27 + $0x44] sm:$0xf] }
 0x175   :  { %1043 = vmatpush.bf16.msra.mxu2 %v3285_v15  ;;  %1067 = vmatpush.bf16.msra.mxu3 %v3288_v38  ;;  %v2856_v15 = vld [vmem:[%s4607_s27 + $0x48] sm:$0xf0]  ;;  %v2810_v38 = vld [vmem:[%s4607_s27 + $0x90] sm:$0xf] }
 0x176   :  { %v2859_v17 = vor.u32 %v3297_v34, %v2856_v15  ;;  %v3302_v34 = vld [vmem:[%s4607_s27 + $0x64] sm:$0xf0] }
 0x179   :  { %1044 = vmatpush.bf16.msra.mxu2 %v3284_v48  ;;  %1068 = vmatpush.bf16.msra.mxu3 %v3287_v57  ;;  %v1107_v48 = vld [vmem:[%s4607_s27 + $0xa0] sm:$0xff]  ;;  %v2815_v57 = vor.u32 %v3307_v51, %v2812_v52 }
 0x17a   :  { %v1144_v3 = vunpack.c.l.b16 %v1107_v48 }
 0x17b   :  { %v1174_v37 = vrot.slane %v2815_v57, 2  ;;  %v3328_v57 = vld [vmem:[%s4607_s27 + $0x13c] sm:$0xf0] }
 0x17c   :  { %v1156_v26 = vpack.c.b16 %v1144_v3, %v1144_v3  ;;  %v2788_v3 = vld [vmem:[%s4607_s27 + $0x68] sm:$0xf0] }
 0x17d   :  { %1045 = vmatpush.bf16.msra.mxu2 %v3283_v5  ;;  %v1145_v5 = vunpack.c.h.b16 %v1107_v48  ;;  %v3301_v48 = vld [vmem:[%s4607_s27 + $0x64] sm:$0xf] }
 0x17f   :  { %v1157_v27 = vpack.c.b16 %v1145_v5, %v1145_v5  ;;  %v2791_v5 = vor.u32 %v3301_v48, %v2788_v3  ;;  %v3318_v48 = vld [vmem:[%s4607_s27 + $0xec] sm:$0xf0]  ;;  %v3317_v3 = vld [vmem:[%s4607_s27 + $0xec] sm:$0xf] }
 0x180   :  { %2688 = vmatmul.msk.bf16.vlgmr.msrb.gmra.mxu2 %vm701_vm5, %v3267_v13  ;;  %2690 = vmatmul.msk.bf16.vlgmr.msrb.gmra.mxu3 %vm701_vm5, %v3267_v13 }
 0x181   :  { %1046 = vmatpush.bf16.msra.mxu2 %v3282_v59  ;;  %1327 = vmatpush.bf16.msrb.mxu3 %v1305_v41  ;;  %v3296_v59 = vld [vmem:[%s4607_s27 + $0x34] sm:$0xf0]  ;;  %v1162_v44 = vrot.slane %v2791_v5, 2  ;;  %v2900_v5 = vld [vmem:[%s4607_s27 + $0xf0] sm:$0xf0] }
 0x182   :  { %v2847_v18 = vor.u32 %v3296_v59, %v2846_v45 }
 0x185   :  { %1047 = vmatpush.bf16.msra.mxu2 %v3281_v7  ;;  %1328 = vmatpush.bf16.msrb.mxu3 %v2859_v17  ;;  %v3294_v7 = vld [vmem:[%s4607_s27 + $0x24] sm:$0xf0] }
 0x186   :  { %v2839_v20 = vor.u32 %v3294_v7, %v2838_v62  ;;  %v3299_v7 = vld [vmem:[%s4607_s27 + $0x54] sm:$0xc] }
 0x189   :  { %1048 = vmatpush.bf16.msra.mxu2 %v3280_v49  ;;  %1329 = vmatpush.bf16.msrb.mxu3 %v2851_v28  ;;  %v2840_v49 = vld [vmem:[%s4607_s27 + $0x28] sm:$0xf0] }
 0x18d   :  { %1049 = vmatpush.bf16.msra.mxu2 %v3279_v50 }
 0x190   :  { %2689 = vmatmul.msk.bf16.gmra.mxu2 %vm701_vm5, %v2687_v14  ;;  %2691 = vmatmul.msk.bf16.gmra.mxu3 %vm701_vm5, %v2687_v14  ;;  %v2854_v14 = vld [vmem:[%s4607_s27 + $0x40] sm:$0xf] }
 0x191   :  { %1309 = vmatpush.bf16.msrb.mxu2 %v1302_v1  ;;  %v2855_v43 = vor.u32 %v3298_v10, %v2854_v14  ;;  %v2804_v1 = vld [vmem:[%s4607_s27 + $0x88] sm:$0xf0]  ;;  %v2786_v10 = vld [vmem:[%s4607_s27 + $0x60] sm:$0xf] }
 0x192   :  { %v2787_v17 = vor.u32 %v3302_v34, %v2786_v10 }
 0x194   :  { %v1159_v60 = vrot.slane %v2787_v17, 2 }
 0x195   :  { %1310 = vmatpush.bf16.msrb.mxu2 %v2855_v43 }
 0x199   :  { %1311 = vmatpush.bf16.msrb.mxu2 %v2847_v18  ;;  %v1476_v18 = vld [vmem:[%s4607_s27 + $0x148] sm:$0xff] }
 0x19a   :  { %v1513_v28 = vunpack.c.l.b16 %v1476_v18 }
 0x19d   :  { %1312 = vmatpush.bf16.msrb.mxu2 %v2839_v20  ;;  %v1525_v20 = vpack.c.b16 %v1513_v28, %v1513_v28  ;;  %v3321_v28 = vld [vmem:[%s4607_s27 + $0x10c] sm:$0xf] }
 0x1e3   :  { %v724_v36 = vpop.f32.mrf.mxu2  ;;  %v743_v61 = vpop.f32.mrf.mxu3 }
 0x1eb   :  { %v726_v39 = vpop.f32.mrf.mxu2  ;;  %v745_v40 = vpop.f32.mrf.mxu3 }
 0x1f3   :  { %v729_v58 = vpop.f32.mrf.mxu2  ;;  %v748_v35 = vpop.f32.mrf.mxu3 }
 0x1fb   :  { %v731_v21 = vpop.f32.mrf.mxu2  ;;  %v750_v33 = vpop.f32.mrf.mxu3 }
 0x203   :  { %v782_v55 = vpop.f32.mrf.mxu2  ;;  %v801_v56 = vpop.f32.mrf.mxu3 }
 0x204   :  { %v811_v42 = vmax.f32 %v724_v36, %v782_v55  ;;  %v812_v19 = vmax.f32 %v743_v61, %v801_v56  ;;  %v1176_v36 = vrot.slane %v1156_v26, 2  ;;  %v1178_v61 = vrot.slane %v1157_v27, 2  ;;  %v2802_v55 = vld [vmem:[%s4607_s27 + $0x80] sm:$0xf]  ;;  %v2778_v26 = vld [vmem:[%s4607_s27 + $0x50] sm:$0xc] }
 0x205   :  { %v3300_v27 = vld [vmem:[%s4607_s27 + $0x54] sm:$0xf0] }
 0x206   :  { %v1199_v8 = vsel %vm1197_vm6, %v1176_v36, 0  ;;  %v1202_v47 = vsel %vm1197_vm6, %v1178_v61, 0  ;;  %v2779_v62 = vor.u32 %v3300_v27, %v2778_v26 }
 0x207   :  { %1206 = vmatpush.bf16.msra.mxu0 %v1199_v8  ;;  %1224 = vmatpush.bf16.msra.mxu1 %v1202_v47 }
 0x20b   :  { %v784_v32 = vpop.f32.mrf.mxu2  ;;  %v803_v16 = vpop.f32.mrf.mxu3 }
 0x20c   :  { %v813_v22 = vmax.f32 %v726_v39, %v784_v32  ;;  %v814_v23 = vmax.f32 %v745_v40, %v803_v16  ;;  %v2843_v39 = vor.u32 %v3293_v46, %v2840_v49  ;;  %v3308_v40 = vld [vmem:[%s4607_s27 + $0x94] sm:$0xf0]  ;;  %v1179_v32 = vsel %vm113_vm0, %v1174_v37, %v1178_v61  ;;  %v2780_v46 = vld [vmem:[%s4607_s27 + $0x58] sm:$0xf0] }
 0x20d   :  { %v2811_v50 = vor.u32 %v3308_v40, %v2810_v38  ;;  %v2803_v16 = vor.u32 %v3306_v63, %v2802_v55  ;;  %1225 = vmatpush.bf16.msra.mxu1 %v1179_v32  ;;  %v2783_v47 = vor.u32 %v3299_v7, %v2780_v46  ;;  %v1158_v38 = vrot.slane %v2779_v62, 2  ;;  %v2920_v7 = vld [vmem:[%s4607_s27 + $0x110] sm:$0xf0] }
 0x20e   :  { %v840_v24 = vpack.c.bf16 %v813_v22, %v811_v42  ;;  %v841_v2 = vpack.c.bf16 %v814_v23, %v812_v19  ;;  %1330 = vmatpush.bf16.msrb.mxu3 %v2843_v39  ;;  %v2807_v42 = vor.u32 %v3305_v0, %v2804_v1  ;;  %v2822_v19 = vld [vmem:[%s4607_s27] sm:$0xf]  ;;  %v3290_v22 = vld [vmem:[%s4607_s27 + $0x4] sm:$0xf0]  ;;  %v3289_v23 = vld [vmem:[%s4607_s27 + $0x4] sm:$0xf] }
 0x20f   :  { %v1161_v39 = vrot.slane %v2783_v47, 2  ;;  %v1545_v40 = vrot.slane %v1525_v20, 2  ;;  %v1160_v52 = vsel %vm113_vm0, %v1158_v38, %v1159_v60  ;;  %v2934_v1 = vld [vmem:[%s4607_s27 + $0x128] sm:$0xf]  ;;  %v2923_v20 = vor.u32 %v3321_v28, %v2920_v7 }
 0x210   :  { %925 = vmatmul.bf16.vlgmr.msrb.gmra.mxu0 %v840_v24  ;;  %2732 = vmatmul.msk.bf16.vlgmr.msrb.gmra.mxu1 %vm907_vm7, %v841_v2 }
 0x211   :  { %1050 = vmatmul.bf16.vlgmr.msra.gmra.mxu2 %v840_v24  ;;  %2774 = vmatmul.msk.bf16.vlgmr.msra.gmra.mxu3 %vm907_vm7, %v841_v2  ;;  %v1168_v24 = vrot.slane %v2803_v16, 2  ;;  %v1170_v2 = vrot.slane %v2807_v42, 2  ;;  %v3325_v42 = vld [vmem:[%s4607_s27 + $0x12c] sm:$0xf]  ;;  %v1531_v38 = vrot.slane %v2923_v20, 2 }
 0x213   :  { %v787_v4 = vpop.f32.mrf.mxu2  ;;  %v806_v25 = vpop.f32.mrf.mxu3 }
 0x214   :  { %v815_v30 = vmax.f32 %v729_v58, %v787_v4  ;;  %v816_v6 = vmax.f32 %v748_v35, %v806_v25  ;;  %v2830_v58 = vld [vmem:[%s4607_s27 + $0x10] sm:$0xf]  ;;  %v3292_v35 = vld [vmem:[%s4607_s27 + $0x14] sm:$0xf0]  ;;  %v2823_v4 = vor.u32 %v3290_v22, %v2822_v19  ;;  %v2824_v25 = vld [vmem:[%s4607_s27 + $0x8] sm:$0xf0] }
 0x215   :  { %v2831_v53 = vor.u32 %v3292_v35, %v2830_v58  ;;  %v3327_v58 = vld [vmem:[%s4607_s27 + $0x13c] sm:$0xf]  ;;  %v1163_v35 = vsel %vm113_vm0, %v1161_v39, %v1162_v44  ;;  %v2936_v19 = vld [vmem:[%s4607_s27 + $0x130] sm:$0xf0]  ;;  %v2910_v39 = vld [vmem:[%s4607_s27 + $0xf8] sm:$0xc] }
 0x217   :  { %1313 = vmatpush.bf16.msrb.mxu2 %v2831_v53  ;;  %v2944_v53 = vld [vmem:[%s4607_s27 + $0x140] sm:$0xf0] }
 0x21b   :  { %v789_v29 = vpop.f32.mrf.mxu2  ;;  %v808_v31 = vpop.f32.mrf.mxu3  ;;  %1314 = vmatpush.bf16.msrb.mxu2 %v2823_v4 }
 0x21c   :  { %v817_v11 = vmax.f32 %v731_v21, %v789_v29  ;;  %v818_v13 = vmax.f32 %v750_v33, %v808_v31  ;;  %v3291_v21 = vld [vmem:[%s4607_s27 + $0x14] sm:$0xf]  ;;  %v1172_v33 = vrot.slane %v2811_v50, 2  ;;  %v2794_v29 = vld [vmem:[%s4607_s27 + $0x70] sm:$0xf]  ;;  %v2827_v31 = vor.u32 %v3289_v23, %v2824_v25 }
 0x21d   :  { %v2835_v56 = vor.u32 %v3291_v21, %v2832_v54  ;;  %v2942_v50 = vld [vmem:[%s4607_s27 + $0x138] sm:$0xf]  ;;  %v1566_v21 = vsel %vm1197_vm6, %v1545_v40, 0  ;;  %v2947_v54 = vor.u32 %v3327_v58, %v2944_v53  ;;  %v2939_v23 = vor.u32 %v3325_v42, %v2936_v19  ;;  %v2912_v58 = vld [vmem:[%s4607_s27 + $0x100] sm:$0xf0] }
 0x21e   :  { %v842_v9 = vpack.c.bf16 %v817_v11, %v815_v30  ;;  %v843_v12 = vpack.c.bf16 %v818_v13, %v816_v6  ;;  %v1177_v41 = vsel %vm113_vm0, %v1172_v33, %v1176_v36  ;;  %v3304_v30 = vld [vmem:[%s4607_s27 + $0x74] sm:$0xf0]  ;;  %v3303_v6 = vld [vmem:[%s4607_s27 + $0x74] sm:$0xf]  ;;  %v2796_v11 = vld [vmem:[%s4607_s27 + $0x78] sm:$0xf0]  ;;  %v1173_v13 = vsel %vm113_vm0, %v1168_v24, %v1172_v33 }
 0x21f   :  { %1207 = vmatpush.bf16.msra.mxu0 %v1177_v41  ;;  %1331 = vmatpush.bf16.msrb.mxu3 %v2835_v56  ;;  %v2799_v14 = vor.u32 %v3303_v6, %v2796_v11  ;;  %v1514_v36 = vunpack.c.h.b16 %v1476_v18  ;;  %v1543_v0 = vrot.slane %v2947_v54, 2  ;;  %v3326_v41 = vld [vmem:[%s4607_s27 + $0x12c] sm:$0xf0]  ;;  %v1539_v4 = vrot.slane %v2939_v23, 2  ;;  %v2890_v53 = vld [vmem:[%s4607_s27 + $0xd8] sm:$0xf] }
 0x220   :  { %930 = vmatmul.bf16.gmra.mxu0 %v842_v9  ;;  %2733 = vmatmul.msk.bf16.gmra.mxu1 %vm907_vm7, %v843_v12  ;;  %v2935_v16 = vor.u32 %v3326_v41, %v2934_v1  ;;  %v3316_v54 = vld [vmem:[%s4607_s27 + $0xdc] sm:$0xf0]  ;;  %v2892_v41 = vld [vmem:[%s4607_s27 + $0xe0] sm:$0xf0]  ;;  %v2882_v19 = vld [vmem:[%s4607_s27 + $0xc8] sm:$0xf] }
 0x221   :  { %1055 = vmatmul.bf16.gmra.mxu2 %v842_v9  ;;  %2775 = vmatmul.msk.bf16.gmra.mxu3 %vm907_vm7, %v843_v12  ;;  %v1175_v9 = vsel %vm113_vm0, %v1170_v2, %v1174_v37  ;;  %v2795_v12 = vor.u32 %v3304_v30, %v2794_v29  ;;  %v1166_v15 = vrot.slane %v2799_v14, 2  ;;  %v1526_v49 = vpack.c.b16 %v1514_v36, %v1514_v36  ;;  %v3324_v30 = vld [vmem:[%s4607_s27 + $0x11c] sm:$0xf0] }
 0x222   :  { %1226 = vmatpush.bf16.msra.mxu1 %v1175_v9  ;;  %v2943_v37 = vor.u32 %v3328_v57, %v2942_v50  ;;  %1573 = vmatpush.bf16.msra.mxu2 %v1566_v21  ;;  %v2928_v9 = vld [vmem:[%s4607_s27 + $0x120] sm:$0xf0]  ;;  %v1544_v34 = vsel %vm113_vm0, %v1539_v4, %v1543_v0  ;;  %v3319_v57 = vld [vmem:[%s4607_s27 + $0xfc] sm:$0xc] }
 0x223   :  { %1208 = vmatpush.bf16.msra.mxu0 %v1173_v13  ;;  %1332 = vmatpush.bf16.msrb.mxu3 %v2827_v31  ;;  %v1164_v43 = vrot.slane %v2795_v12, 2  ;;  %v1171_v59 = vsel %vm113_vm0, %v1166_v15, %v1170_v2  ;;  %v1167_v8 = vsel %vm113_vm0, %v1162_v44, %v1166_v15  ;;  %v1547_v51 = vrot.slane %v1526_v49, 2  ;;  %v1353_v2 = vld [vmem:[%s4607_s27 + $0xf8] sm:$0x33]  ;;  %v2898_v12 = vld [vmem:[%s4607_s27 + $0xe8] sm:$0xf] }
 0x224   :  { %v1541_v55 = vrot.slane %v2943_v37, 2  ;;  %v1388_v25 = vunpack.c.l.b16 %v1353_v2  ;;  %v1389_v29 = vunpack.c.h.b16 %v1353_v2  ;;  %v2926_v31 = vld [vmem:[%s4607_s27 + $0x118] sm:$0xf]  ;;  %v3323_v13 = vld [vmem:[%s4607_s27 + $0x11c] sm:$0xf]  ;;  %v2899_v27 = vor.u32 %v3318_v48, %v2898_v12 }
 0x225   :  { %v1169_v45 = vsel %vm113_vm0, %v1164_v43, %v1168_v24  ;;  %v1165_v61 = vsel %vm113_vm0, %v1159_v60, %v1164_v43  ;;  %v1569_v33 = vsel %vm1197_vm6, %v1547_v51, 0  ;;  %v1548_v22 = vsel %vm113_vm0, %v1543_v0, %v1547_v51  ;;  %v3322_v60 = vld [vmem:[%s4607_s27 + $0x10c] sm:$0xf0]  ;;  %v3312_v12 = vld [vmem:[%s4607_s27 + $0xbc] sm:$0xf0] }
 0x226   :  { %1227 = vmatpush.bf16.msra.mxu1 %v1171_v59  ;;  %v1546_v32 = vsel %vm113_vm0, %v1541_v55, %v1545_v40  ;;  %v1537_v24 = vrot.slane %v2935_v16, 2  ;;  %v2927_v11 = vor.u32 %v3324_v30, %v2926_v31  ;;  %v1400_v43 = vpack.c.b16 %v1388_v25, %v1388_v25  ;;  %v2918_v59 = vld [vmem:[%s4607_s27 + $0x108] sm:$0xf]  ;;  %v3320_v40 = vld [vmem:[%s4607_s27 + $0xfc] sm:$0xf0] }
 0x227   :  { %1209 = vmatpush.bf16.msra.mxu0 %v1169_v45  ;;  %1591 = vmatpush.bf16.msra.mxu3 %v1569_v33  ;;  %v1401_v15 = vpack.c.b16 %v1389_v29, %v1389_v29  ;;  %v2931_v17 = vor.u32 %v3323_v13, %v2928_v9  ;;  %v2919_v62 = vor.u32 %v3322_v60, %v2918_v59  ;;  %v2884_v25 = vld [vmem:[%s4607_s27 + $0xd0] sm:$0xf0]  ;;  %v2874_v9 = vld [vmem:[%s4607_s27 + $0xb8] sm:$0xf]  ;;  %v3309_v59 = vld [vmem:[%s4607_s27 + $0xac] sm:$0xf] }
 0x228   :  { %1574 = vmatpush.bf16.msra.mxu2 %v1546_v32  ;;  %v1542_v6 = vsel %vm113_vm0, %v1537_v24, %v1541_v55  ;;  %v1533_v45 = vrot.slane %v2927_v11, 2  ;;  %v1419_v18 = vsel %vm1197_vm6, %v1400_v43, 0  ;;  %v2911_v50 = vor.u32 %v3320_v40, %v2910_v39  ;;  %v3315_v55 = vld [vmem:[%s4607_s27 + $0xdc] sm:$0xf]  ;;  %v2868_v60 = vld [vmem:[%s4607_s27 + $0xb0] sm:$0xf0] }
 0x229   :  { %v1422_v44 = vsel %vm1197_vm6, %v1401_v15, 0  ;;  %v1535_v26 = vrot.slane %v2931_v17, 2  ;;  %v1528_v49 = vrot.slane %v2919_v62, 2  ;;  %v2915_v0 = vor.u32 %v3319_v57, %v2912_v58  ;;  %v3311_v43 = vld [vmem:[%s4607_s27 + $0xbc] sm:$0xf] }
 0x22a   :  { %1228 = vmatpush.bf16.msra.mxu1 %v1167_v8  ;;  %v1538_v36 = vsel %vm113_vm0, %v1533_v45, %v1537_v24  ;;  %v1527_v32 = vrot.slane %v2911_v50, 2  ;;  %v2895_v16 = vor.u32 %v3315_v55, %v2892_v41  ;;  %v2876_v15 = vld [vmem:[%s4607_s27 + $0xc0] sm:$0xf0]  ;;  %v2866_v17 = vld [vmem:[%s4607_s27 + $0xa8] sm:$0xf] }
 0x22b   :  { %1210 = vmatpush.bf16.msra.mxu0 %v1165_v61  ;;  %1592 = vmatpush.bf16.msra.mxu3 %v1548_v22  ;;  %v2903_v61 = vor.u32 %v3317_v3, %v2900_v5  ;;  %v1540_v47 = vsel %vm113_vm0, %v1535_v26, %v1539_v4  ;;  %v1536_v37 = vsel %vm113_vm0, %v1531_v38, %v1535_v26  ;;  %v1530_v42 = vrot.slane %v2915_v0, 2  ;;  %v3314_v22 = vld [vmem:[%s4607_s27 + $0xcc] sm:$0xf0]  ;;  %v3313_v4 = vld [vmem:[%s4607_s27 + $0xcc] sm:$0xf] }
 0x22c   :  { %1575 = vmatpush.bf16.msra.mxu2 %v1542_v6  ;;  %v1529_v2 = vsel %vm113_vm0, %v1527_v32, %v1528_v49  ;;  %v2883_v31 = vor.u32 %v3314_v22, %v2882_v19  ;;  %v2887_v30 = vor.u32 %v3313_v4, %v2884_v25  ;;  %v2879_v5 = vor.u32 %v3311_v43, %v2876_v15  ;;  %v3338_v58 = vld [vmem:[%s4607_s27 + $0x194] sm:$0xf0]  ;;  %v2980_v32 = vld [vmem:[%s4607_s27 + $0x188] sm:$0xf0] }
 0x22d   :  { %v1532_v29 = vsel %vm113_vm0, %v1530_v42, %v1531_v38  ;;  %v2871_v26 = vor.u32 %v3309_v59, %v2868_v60  ;;  %v1623_v38 = vld [vmem:[%s4607_s27 + $0x1a0] sm:$0x33]  ;;  %v3334_v42 = vld [vmem:[%s4607_s27 + $0x174] sm:$0xf0] }
 0x22e   :  { %1229 = vmatpush.bf16.msra.mxu1 %v1163_v35  ;;  %v1657_v39 = vunpack.c.l.b16 %v1623_v38  ;;  %v1658_v40 = vunpack.c.h.b16 %v1623_v38 }
 0x22f   :  { %1211 = vmatpush.bf16.msra.mxu0 %v1160_v52  ;;  %1593 = vmatpush.bf16.msra.mxu3 %v1544_v34  ;;  %v1534_v52 = vsel %vm113_vm0, %v1528_v49, %v1533_v45  ;;  %v2875_v34 = vor.u32 %v3312_v12, %v2874_v9  ;;  %v3310_v45 = vld [vmem:[%s4607_s27 + $0xac] sm:$0xf0] }
 0x230   :  { %1576 = vmatpush.bf16.msra.mxu2 %v1538_v36  ;;  %v1669_v50 = vpack.c.b16 %v1657_v39, %v1657_v39  ;;  %v1670_v57 = vpack.c.b16 %v1658_v40, %v1658_v40  ;;  %v2954_v12 = vld [vmem:[%s4607_s27 + $0x150] sm:$0xf] }
 0x232   :  { %1444 = vmatpush.bf16.msrb.mxu1 %v1422_v44  ;;  %v2867_v44 = vor.u32 %v3310_v45, %v2866_v17 }
 0x233   :  { %1426 = vmatpush.bf16.msrb.mxu0 %v1419_v18  ;;  %1594 = vmatpush.bf16.msra.mxu3 %v1540_v47 }
 0x234   :  { %1577 = vmatpush.bf16.msra.mxu2 %v1534_v52  ;;  %v2986_v52 = vld [vmem:[%s4607_s27 + $0x190] sm:$0xf] }
 0x236   :  { %1445 = vmatpush.bf16.msrb.mxu1 %v2903_v61 }
 0x237   :  { %1427 = vmatpush.bf16.msrb.mxu0 %v2899_v27  ;;  %1595 = vmatpush.bf16.msra.mxu3 %v1536_v37  ;;  %v1691_v37 = vsel %vm1197_vm6, %v1670_v57, 0 }
 0x238   :  { %1578 = vmatpush.bf16.msra.mxu2 %v1529_v2 }
 0x23a   :  { %1446 = vmatpush.bf16.msrb.mxu1 %v2895_v16  ;;  %v2970_v16 = vld [vmem:[%s4607_s27 + $0x170] sm:$0xf] }
 0x23b   :  { %1596 = vmatpush.bf16.msra.mxu3 %v1532_v29  ;;  %v2971_v2 = vor.u32 %v3334_v42, %v2970_v16  ;;  %v2962_v29 = vld [vmem:[%s4607_s27 + $0x160] sm:$0xf] }
 0x23c   :  { %v1735_v42 = vld [vmem:[%s4581_s4] sm:$0x3] }
 0x23e   :  { %1447 = vmatpush.bf16.msrb.mxu1 %v2887_v30  ;;  %v3331_v30 = vld [vmem:[%s4607_s27 + $0x164] sm:$0xf] }
 0x242   :  { %1448 = vmatpush.bf16.msrb.mxu1 %v2879_v5 }
 0x246   :  { %1449 = vmatpush.bf16.msrb.mxu1 %v2871_v26 }
 0x28d   :  { %v4121_v56 = vpop.f32.mrf.mxu0  ;;  %v4123_v63 = vpop.f32.mrf.mxu1 }
 0x28e   :  { %v946_v35 = vadd.f32 %v4123_v63, %v4121_v56  ;;  %v2891_v63 = vor.u32 %v3316_v54, %v2890_v53  ;;  %v2987_v54 = vor.u32 %v3338_v58, %v2986_v52 }
 0x290   :  { %1428 = vmatpush.bf16.msrb.mxu0 %v2891_v63  ;;  %v3335_v63 = vld [vmem:[%s4607_s27 + $0x184] sm:$0xf] }
 0x291   :  { %v2983_v22 = vor.u32 %v3335_v63, %v2980_v32 }
 0x294   :  { %v1051_v14 = vpop.f32.mrf.mxu2  ;;  %v1070_v10 = vpop.f32.mrf.mxu3  ;;  %1429 = vmatpush.bf16.msrb.mxu0 %v2883_v31  ;;  %v3332_v31 = vld [vmem:[%s4607_s27 + $0x164] sm:$0xf0] }
 0x295   :  { %v928_v46 = vpop.f32.mrf.mxu0  ;;  %v947_v8 = vpop.f32.mrf.mxu1  ;;  %v1071_v51 = vadd.f32 %v1070_v10, %v1051_v14 }
 0x296   :  { %v948_v1 = vadd.f32 %v947_v8, %v928_v46 }
 0x297   :  { %v1080_v23 = vmax.f32 %v946_v35, %v1071_v51  ;;  %v3337_v35 = vld [vmem:[%s4607_s27 + $0x194] sm:$0xf] }
 0x298   :  { %1430 = vmatpush.bf16.msrb.mxu0 %v2875_v34  ;;  %v2956_v34 = vld [vmem:[%s4607_s27 + $0x158] sm:$0xf0] }
 0x29c   :  { %v1053_v21 = vpop.f32.mrf.mxu2  ;;  %v1072_v33 = vpop.f32.mrf.mxu3  ;;  %1431 = vmatpush.bf16.msrb.mxu0 %v2867_v44 }
 0x29d   :  { %v1073_v56 = vadd.f32 %v1072_v33, %v1053_v21  ;;  %v931_v11 = vpop.f32.mrf.mxu0  ;;  %v950_v13 = vpop.f32.mrf.mxu1  ;;  %v2988_v21 = vld [vmem:[%s4607_s27 + $0x198] sm:$0xf0]  ;;  %v1688_v33 = vsel %vm1197_vm6, %v1669_v50, 0 }
 0x29e   :  { %v951_v48 = vadd.f32 %v950_v13, %v931_v11  ;;  %v2991_v55 = vor.u32 %v3337_v35, %v2988_v21  ;;  %v2964_v11 = vld [vmem:[%s4607_s27 + $0x168] sm:$0xf0]  ;;  %v2963_v13 = vor.u32 %v3332_v31, %v2962_v29  ;;  %v1738_v29 = vperm.slane %v1735_v42, 1 }
 0x29f   :  { %v1081_v24 = vmax.f32 %v948_v1, %v1073_v56  ;;  %v2978_v1 = vld [vmem:[%s4607_s27 + $0x180] sm:$0xf]  ;;  %v3336_v56 = vld [vmem:[%s4607_s27 + $0x184] sm:$0xf0]  ;;  %v2967_v9 = vor.u32 %v3331_v30, %v2964_v11 }
 0x2a0   :  { %v2979_v41 = vor.u32 %v3336_v56, %v2978_v1 }
 0x2a1   :  { %v4226_v6 = vpack.c.bf16 %v1081_v24, %v1080_v23  ;;  %v3333_v23 = vld [vmem:[%s4607_s27 + $0x174] sm:$0xf] }
 0x2a3   :  { %2860 = vmatmul.msk.bf16.vlgmr.msrb.gmra.mxu2 %vm1190_vm8, %v4226_v6  ;;  %2862 = vmatmul.msk.bf16.vlgmr.msrb.gmra.mxu3 %vm1190_vm8, %v4226_v6  ;;  %v1110_v36 = vrot.slane %v4226_v6, 1  ;;  %v1479_v19 = vrot.slane %v4226_v6, 3  ;;  %v1354_v17 = vrot.slane %v4226_v6, 2 }
 0x2a4   :  { %v1056_v14 = vpop.f32.mrf.mxu2  ;;  %v1075_v10 = vpop.f32.mrf.mxu3 }
 0x2a5   :  { %v1076_v3 = vadd.f32 %v1075_v10, %v1056_v14  ;;  %v933_v8 = vpop.f32.mrf.mxu0  ;;  %v952_v47 = vpop.f32.mrf.mxu1  ;;  %v3330_v14 = vld [vmem:[%s4607_s27 + $0x154] sm:$0xf0]  ;;  %v3329_v10 = vld [vmem:[%s4607_s27 + $0x154] sm:$0xf] }
 0x2a6   :  { %v953_v49 = vadd.f32 %v952_v47, %v933_v8  ;;  %v2955_v15 = vor.u32 %v3330_v14, %v2954_v12 }
 0x2a7   :  { %v1082_v18 = vmax.f32 %v951_v48, %v1076_v3  ;;  %v2959_v48 = vor.u32 %v3329_v10, %v2956_v34 }
 0x2a9   :  { %v4256_v27 = vpack.c.bf16 %v1082_v18, %v1082_v18  ;;  %v4258_v28 = vpack.c.bf16 %v1082_v18, %v1081_v24  ;;  %v2972_v24 = vld [vmem:[%s4607_s27 + $0x178] sm:$0xf0] }
 0x2aa   :  { %v2975_v25 = vor.u32 %v3333_v23, %v2972_v24 }
 0x2ab   :  { %v1111_v61 = vrot.slane %v4256_v27, 1  ;;  %v1355_v43 = vrot.slane %v4256_v27, 2 }
 0x2ac   :  { %v1058_v7 = vpop.f32.mrf.mxu2  ;;  %v1077_v46 = vpop.f32.mrf.mxu3 }
 0x2ad   :  { %v1112_v62 = vsel %vm89_vm1, %v1110_v36, %v1111_v61  ;;  %v1078_v20 = vadd.f32 %v1077_v46, %v1058_v7  ;;  %v1356_v3 = vsel %vm113_vm0, %v1354_v17, %v1355_v43 }
 0x2ae   :  { %2816 = vmatmul.msk.bf16.vlgmr.msra.gmra.mxu0 %vm1190_vm8, %v1112_v62  ;;  %2818 = vmatmul.msk.bf16.vlgmr.msra.gmra.mxu1 %vm1190_vm8, %v1112_v62 }
 0x2af   :  { %v4272_v51 = vmax.f32 %v953_v49, %v1078_v20  ;;  %1695 = vmatpush.bf16.msra.mxu0 %v1688_v33  ;;  %1713 = vmatpush.bf16.msra.mxu1 %v1691_v37 }
 0x2b1   :  { %v1477_v53 = vpack.c.bf16 %v4272_v51, %v1082_v18  ;;  %v1625_v6 = vpack.c.bf16 %v4272_v51, %v4272_v51 }
 0x2b3   :  { %2861 = vmatmul.msk.bf16.gmra.mxu2 %vm1190_vm8, %v4256_v27  ;;  %2863 = vmatmul.msk.bf16.gmra.mxu3 %vm1190_vm8, %v4256_v27  ;;  %v1480_v0 = vrot.slane %v1477_v53, 3 }
 0x2b4   :  { %1696 = vmatpush.bf16.msra.mxu0 %v2987_v54  ;;  %1714 = vmatpush.bf16.msra.mxu1 %v2991_v55 }
 0x2b5   :  { %v1481_v4 = vsel %vm411_vm3, %v1479_v19, %v1480_v0 }
 0x2b8   :  { %1697 = vmatpush.bf16.msra.mxu0 %v2979_v41  ;;  %1715 = vmatpush.bf16.msra.mxu1 %v2983_v22 }
 0x2bc   :  { %1698 = vmatpush.bf16.msra.mxu0 %v2971_v2  ;;  %1716 = vmatpush.bf16.msra.mxu1 %v2975_v25 }
 0x2be   :  { %2817 = vmatmul.msk.bf16.gmra.mxu0 %vm1190_vm8, %v1111_v61  ;;  %2819 = vmatmul.msk.bf16.gmra.mxu1 %vm1190_vm8, %v1111_v61 }
 0x2c0   :  { %1699 = vmatpush.bf16.msra.mxu0 %v2963_v13  ;;  %1717 = vmatpush.bf16.msra.mxu1 %v2967_v9 }
 0x2c3   :  { %2948 = vmatmul.msk.bf16.vlgmr.msra.gmra.mxu2 %vm1190_vm8, %v1481_v4  ;;  %2950 = vmatmul.msk.bf16.vlgmr.msra.gmra.mxu3 %vm1190_vm8, %v1481_v4  ;;  %v1737_v4 = vperm.slane %v1735_v42, 0  ;;  %v3343_v42 = vld [vmem:[%s4594_s17 + $0x10] sm:$0xff] }
 0x2c4   :  { %1700 = vmatpush.bf16.msra.mxu0 %v2955_v15  ;;  %1718 = vmatpush.bf16.msra.mxu1 %v2959_v48 }
 0x2ce   :  { %2904 = vmatmul.msk.bf16.vlgmr.msrb.gmra.mxu0 %vm1190_vm8, %v1356_v3  ;;  %2906 = vmatmul.msk.bf16.vlgmr.msrb.gmra.mxu1 %vm1190_vm8, %v1356_v3 }
 0x2d3   :  { %2949 = vmatmul.msk.bf16.gmra.mxu2 %vm1190_vm8, %v1480_v0  ;;  %2951 = vmatmul.msk.bf16.gmra.mxu3 %vm1190_vm8, %v1480_v0 }
 0x2de   :  { %2905 = vmatmul.msk.bf16.gmra.mxu0 %vm1190_vm8, %v1355_v43  ;;  %2907 = vmatmul.msk.bf16.gmra.mxu1 %vm1190_vm8, %v1355_v43 }
 0x2ee   :  { %2992 = vmatmul.msk.bf16.vlgmr.msra.gmra.mxu0 %vm1190_vm8, %v4258_v28  ;;  %2994 = vmatmul.msk.bf16.vlgmr.msra.gmra.mxu1 %vm1190_vm8, %v4258_v28 }
 0x2fe   :  { %2993 = vmatmul.msk.bf16.gmra.mxu0 %vm1190_vm8, %v1625_v6  ;;  %2995 = vmatmul.msk.bf16.gmra.mxu1 %vm1190_vm8, %v1625_v6 }
 0x326   :  { %v1316_v5 = vpop.f32.mrf.mxu2  ;;  %v1334_v45 = vpop.f32.mrf.mxu3 }
 0x32b   :  { %v1213_v59 = vpop.f32.mrf.mxu0  ;;  %v1231_v60 = vpop.f32.mrf.mxu1 }
 0x32c   :  { %v1317_v18 = vadd.f32 %v1316_v5, %v1213_v59  ;;  %v1335_v44 = vadd.f32 %v1334_v45, %v1231_v60 }
 0x32e   :  { %v1318_v26 = vpop.f32.mrf.mxu2  ;;  %v1336_v27 = vpop.f32.mrf.mxu3 }
 0x333   :  { %v1215_v36 = vpop.f32.mrf.mxu0  ;;  %v1233_v61 = vpop.f32.mrf.mxu1 }
 0x334   :  { %v1319_v62 = vadd.f32 %v1318_v26, %v1215_v36  ;;  %v1337_v7 = vadd.f32 %v1336_v27, %v1233_v61 }
 0x336   :  { %v1321_v28 = vpop.f32.mrf.mxu2  ;;  %v1339_v46 = vpop.f32.mrf.mxu3 }
 0x33b   :  { %v1218_v8 = vpop.f32.mrf.mxu0  ;;  %v1236_v47 = vpop.f32.mrf.mxu1 }
 0x33c   :  { %v1322_v11 = vadd.f32 %v1321_v28, %v1218_v8  ;;  %v1340_v13 = vadd.f32 %v1339_v46, %v1236_v47 }
 0x33e   :  { %v1323_v20 = vpop.f32.mrf.mxu2  ;;  %v1341_v49 = vpop.f32.mrf.mxu3 }
 0x343   :  { %v1220_v38 = vpop.f32.mrf.mxu0  ;;  %v1238_v39 = vpop.f32.mrf.mxu1 }
 0x346   :  { %v1580_v40 = vpop.f32.mrf.mxu2  ;;  %v1598_v51 = vpop.f32.mrf.mxu3 }
 0x34b   :  { %v1433_v52 = vpop.f32.mrf.mxu0  ;;  %v1451_v50 = vpop.f32.mrf.mxu1 }
 0x34c   :  { %v1460_v63 = vadd.f32 %v1433_v52, %v1317_v18  ;;  %v1461_v41 = vadd.f32 %v1451_v50, %v1335_v44  ;;  %v3339_v52 = vld [vmem:[%s4592_s15] sm:$0x10] }
 0x34e   :  { %v1582_v57 = vpop.f32.mrf.mxu2  ;;  %v1600_v58 = vpop.f32.mrf.mxu3  ;;  %v1607_v23 = vadd.f32 %v1580_v40, %v1460_v63  ;;  %v1608_v24 = vadd.f32 %v1598_v51, %v1461_v41  ;;  %v2998_v51 = vld [vmem:[%s4592_s15] sm:$0xf]  ;;  %v3344_v63 = vld [vmem:[%s4594_s17 + $0x18] sm:$0xff]  ;;  %v3353_v41 = vld [vmem:[%s4595_s18 + $0x10] sm:$0xff] }
 0x34f   :  { %v2999_v50 = vor.u32 %v3339_v52, %v2998_v51  ;;  %v3381_v51 = vld [vmem:[%s4582_s5 + $0xa0] sm:$0xff]  ;;  %v2378_v52 = vld [vmem:[%s4584_s7 + $0x38] sm:$0xf] }
 0x353   :  { %v1435_v35 = vpop.f32.mrf.mxu0  ;;  %v1453_v21 = vpop.f32.mrf.mxu1 }
 0x354   :  { %v1462_v19 = vadd.f32 %v1435_v35, %v1319_v62  ;;  %v1463_v22 = vadd.f32 %v1453_v21, %v1337_v7  ;;  %v3340_v35 = vld [vmem:[%s4593_s16] sm:$0x10] }
 0x356   :  { %v1585_v33 = vpop.f32.mrf.mxu2  ;;  %v1603_v37 = vpop.f32.mrf.mxu3  ;;  %v1609_v31 = vadd.f32 %v1582_v57, %v1462_v19  ;;  %v1610_v30 = vadd.f32 %v1600_v58, %v1463_v22  ;;  %v3358_v57 = vld [vmem:[%s4595_s18 + $0x38] sm:$0xff]  ;;  %v3004_v58 = vld [vmem:[%s4593_s16] sm:$0xf]  ;;  %v3342_v19 = vld [vmem:[%s4594_s17 + $0x8] sm:$0xff] }
 0x357   :  { %v3005_v21 = vor.u32 %v3340_v35, %v3004_v58  ;;  %v3350_v22 = vld [vmem:[%s4594_s17 + $0x48] sm:$0xff] }
 0x358   :  { %1950 = vmatpush.bf16.msrb.mxu1 %v3350_v22 }
 0x35b   :  { %v1438_v53 = vpop.f32.mrf.mxu0  ;;  %v1456_v54 = vpop.f32.mrf.mxu1 }
 0x35c   :  { %v1464_v15 = vadd.f32 %v1438_v53, %v1322_v11  ;;  %v1465_v17 = vadd.f32 %v1456_v54, %v1340_v13  ;;  %v3356_v53 = vld [vmem:[%s4595_s18 + $0x28] sm:$0xff]  ;;  %v3347_v54 = vld [vmem:[%s4594_s17 + $0x30] sm:$0xff] }
 0x35e   :  { %v1587_v55 = vpop.f32.mrf.mxu2  ;;  %v1605_v0 = vpop.f32.mrf.mxu3  ;;  %v1611_v60 = vadd.f32 %v1585_v33, %v1464_v15  ;;  %v1612_v18 = vadd.f32 %v1603_v37, %v1465_v17  ;;  %v3348_v33 = vld [vmem:[%s4594_s17 + $0x38] sm:$0xff]  ;;  %v3357_v37 = vld [vmem:[%s4595_s18 + $0x30] sm:$0xff] }
 0x35f   :  { %1930 = vmatpush.bf16.msrb.mxu0 %v3348_v33  ;;  %v3346_v55 = vld [vmem:[%s4594_s17 + $0x28] sm:$0xff]  ;;  %v3355_v0 = vld [vmem:[%s4595_s18 + $0x20] sm:$0xff]  ;;  %v3392_v33 = vld [vmem:[%s4584_s7 + $0x30] sm:$0xff] }
 0x363   :  { %v1440_v1 = vpop.f32.mrf.mxu0  ;;  %v1458_v56 = vpop.f32.mrf.mxu1  ;;  %1931 = vmatpush.bf16.msrb.mxu0 %v3347_v54 }
 0x364   :  { %v3354_v1 = vld [vmem:[%s4595_s18 + $0x18] sm:$0xff]  ;;  %v3345_v56 = vld [vmem:[%s4594_s17 + $0x20] sm:$0xff] }
 0x367   :  { %1932 = vmatpush.bf16.msrb.mxu0 %v3346_v55 }
 0x36b   :  { %v1702_v32 = vpop.f32.mrf.mxu0  ;;  %v1720_v16 = vpop.f32.mrf.mxu1  ;;  %1933 = vmatpush.bf16.msrb.mxu0 %v3345_v56 }
 0x36c   :  { %v1729_v2 = vadd.f32 %v1702_v32, %v1607_v23  ;;  %v1730_v25 = vadd.f32 %v1720_v16, %v1608_v24  ;;  %v3360_v32 = vld [vmem:[%s4595_s18 + $0x48] sm:$0xff]  ;;  %v3351_v23 = vld [vmem:[%s4595_s18] sm:$0xff] }
 0x36d   :  { %v3352_v16 = vld [vmem:[%s4595_s18 + $0x8] sm:$0xff]  ;;  %v3359_v24 = vld [vmem:[%s4595_s18 + $0x40] sm:$0xff] }
 0x36e   :  { %v1741_v14 = vadd.f32 %v1737_v4, %v1729_v2  ;;  %v1742_v10 = vadd.f32 %v1738_v29, %v1730_v25  ;;  %v3341_v2 = vld [vmem:[%s4594_s17] sm:$0xff]  ;;  %v3370_v25 = vld [vmem:[%s4582_s5 + $0x48] sm:$0xff] }
 0x36f   :  { %1934 = vmatpush.bf16.msrb.mxu0 %v3344_v63 }
 0x370   :  { %v1747_v6 = vmax.f32 %v1741_v14, 0.0  ;;  %v1748_v5 = vmax.f32 %v1742_v10, 0.0 }
 0x373   :  { %v1704_v9 = vpop.f32.mrf.mxu0  ;;  %v1722_v12 = vpop.f32.mrf.mxu1  ;;  %1935 = vmatpush.bf16.msrb.mxu0 %v3343_v42 }
 0x374   :  { %v1731_v34 = vadd.f32 %v1704_v9, %v1609_v31  ;;  %v1732_v43 = vadd.f32 %v1722_v12, %v1610_v30  ;;  %v3380_v31 = vld [vmem:[%s4582_s5 + $0x98] sm:$0xff]  ;;  %v3365_v30 = vld [vmem:[%s4582_s5 + $0x20] sm:$0xff] }
 0x375   :  { %v3369_v9 = vld [vmem:[%s4582_s5 + $0x40] sm:$0xff]  ;;  %v3368_v12 = vld [vmem:[%s4582_s5 + $0x38] sm:$0xff] }
 0x376   :  { %v1743_v48 = vadd.f32 %v1737_v4, %v1731_v34  ;;  %v1744_v3 = vadd.f32 %v1738_v29, %v1732_v43 }
 0x377   :  { %1936 = vmatpush.bf16.msrb.mxu0 %v3342_v19 }
 0x378   :  { %v1749_v45 = vmax.f32 %v1743_v48, 0.0  ;;  %v1750_v59 = vmax.f32 %v1744_v3, 0.0 }
 0x37a   :  { %v1755_v44 = vpack.c.bf16 %v1749_v45, %v1747_v6  ;;  %v1756_v26 = vpack.c.bf16 %v1750_v59, %v1748_v5 }
 0x37b   :  { %v1707_v27 = vpop.f32.mrf.mxu0  ;;  %v1725_v36 = vpop.f32.mrf.mxu1  ;;  %1937 = vmatpush.bf16.msrb.mxu0 %v3341_v2 }
 0x37c   :  { %v1733_v61 = vadd.f32 %v1707_v27, %v1611_v60  ;;  %v1734_v62 = vadd.f32 %v1725_v36, %v1612_v18  ;;  %v3364_v60 = vld [vmem:[%s4582_s5 + $0x18] sm:$0xff]  ;;  %v3374_v18 = vld [vmem:[%s4582_s5 + $0x68] sm:$0xff]  ;;  %v3373_v27 = vld [vmem:[%s4582_s5 + $0x60] sm:$0xff] }
 0x37d   :  { %v3378_v36 = vld [vmem:[%s4582_s5 + $0x88] sm:$0xff] }
 0x37e   :  { %v1745_v7 = vadd.f32 %v1737_v4, %v1733_v61  ;;  %v1746_v28 = vadd.f32 %v1738_v29, %v1734_v62  ;;  %v3349_v4 = vld [vmem:[%s4594_s17 + $0x40] sm:$0xff]  ;;  %v3375_v29 = vld [vmem:[%s4582_s5 + $0x70] sm:$0xff]  ;;  %v3362_v61 = vld [vmem:[%s4582_s5 + $0x8] sm:$0xff] }
 0x37f   :  { %1951 = vmatpush.bf16.msrb.mxu1 %v3349_v4  ;;  %2128 = vmatpush.bf16.msra.mxu0 %v3370_v25  ;;  %v3367_v62 = vld [vmem:[%s4582_s5 + $0x30] sm:$0xff]  ;;  %v3391_v4 = vld [vmem:[%s4584_s7 + $0x28] sm:$0xff]  ;;  %v3390_v25 = vld [vmem:[%s4584_s7 + $0x20] sm:$0xff] }
 0x380   :  { %v1751_v46 = vmax.f32 %v1745_v7, 0.0  ;;  %v1752_v8 = vmax.f32 %v1746_v28, 0.0  ;;  %v3372_v7 = vld [vmem:[%s4582_s5 + $0x58] sm:$0xff]  ;;  %v3377_v28 = vld [vmem:[%s4582_s5 + $0x80] sm:$0xff] }
 0x382   :  { %v1757_v47 = vpack.c.bf16 %v1751_v46, %v1751_v46  ;;  %v1758_v20 = vpack.c.bf16 %v1752_v8, %v1752_v8  ;;  %v3361_v46 = vld [vmem:[%s4582_s5] sm:$0xff]  ;;  %v3366_v8 = vld [vmem:[%s4582_s5 + $0x28] sm:$0xff] }
 0x383   :  { %v1709_v49 = vpop.f32.mrf.mxu0  ;;  %v1727_v38 = vpop.f32.mrf.mxu1  ;;  %2174 = vmatpush.bf16.msra.mxu1 %v3365_v30  ;;  %2129 = vmatpush.bf16.msra.mxu0 %v3369_v9  ;;  %v3387_v30 = vld [vmem:[%s4584_s7 + $0x8] sm:$0xff] }
 0x384   :  { %v1769_v39 = vsel %vm1197_vm6, %v1757_v47, 0  ;;  %v1772_v40 = vsel %vm1197_vm6, %v1758_v20, 0  ;;  %v3385_v47 = vld [vmem:[%s4582_s5 + $0xc0] sm:$0xff]  ;;  %v3371_v20 = vld [vmem:[%s4582_s5 + $0x50] sm:$0xff]  ;;  %v3376_v49 = vld [vmem:[%s4582_s5 + $0x78] sm:$0xff] }
 0x385   :  { %1780 = vmatpush.bf16.msrb.mxu2 %v1769_v39  ;;  %1794 = vmatpush.bf16.msrb.mxu3 %v1772_v40  ;;  %v3384_v38 = vld [vmem:[%s4582_s5 + $0xb8] sm:$0xff] }
 0x387   :  { %2130 = vmatpush.bf16.msra.mxu0 %v3368_v12  ;;  %2175 = vmatpush.bf16.msra.mxu1 %v3364_v60 }
 0x389   :  { %1781 = vmatpush.bf16.msrb.mxu2 %v1755_v44  ;;  %1795 = vmatpush.bf16.msrb.mxu3 %v1756_v26 }
 0x38b   :  { %2131 = vmatpush.bf16.msra.mxu0 %v3367_v62 }
 0x38c   :  { %3000 = vmatmul.msk.bf16.vlgmr.msrb.gmra.mxu2 %vm1764_vm9, %v2999_v50  ;;  %3001 = vmatmul.msk.bf16.vlgmr.msrb.gmra.mxu3 %vm1764_vm9, %v2999_v50  ;;  %v2413_v50 = vunpack.c.l.b16 %v2378_v52 }
 0x38d   :  { %1818 = vmatpush.bf16.msra.mxu2 %v1769_v39  ;;  %1832 = vmatpush.bf16.msra.mxu3 %v1772_v40  ;;  %v3383_v39 = vld [vmem:[%s4582_s5 + $0xb0] sm:$0xff]  ;;  %v3382_v40 = vld [vmem:[%s4582_s5 + $0xa8] sm:$0xff] }
 0x38f   :  { %2132 = vmatpush.bf16.msra.mxu0 %v3366_v8  ;;  %v3393_v8 = vld [vmem:[%s4586_s9] sm:$0xff] }
 0x391   :  { %1819 = vmatpush.bf16.msra.mxu2 %v1755_v44  ;;  %1833 = vmatpush.bf16.msra.mxu3 %v1756_v26  ;;  %v3379_v44 = vld [vmem:[%s4582_s5 + $0x90] sm:$0xff] }
 0x392   :  { %v3363_v26 = vld [vmem:[%s4582_s5 + $0x10] sm:$0xff] }
 0x393   :  { %2176 = vmatpush.bf16.msra.mxu1 %v3363_v26 }
 0x395   :  { %2038 = vmatpush.bf16.msrb.mxu2 %v3358_v57  ;;  %2058 = vmatpush.bf16.msrb.mxu3 %v3360_v32  ;;  %v2421_v57 = vpack.c.b16 %v2413_v50, %v2413_v50 }
 0x397   :  { %2177 = vmatpush.bf16.msra.mxu1 %v3362_v61 }
 0x399   :  { %2039 = vmatpush.bf16.msrb.mxu2 %v3357_v37  ;;  %2059 = vmatpush.bf16.msrb.mxu3 %v3359_v24 }
 0x39b   :  { %2178 = vmatpush.bf16.msra.mxu1 %v3361_v46  ;;  %v3394_v46 = vld [vmem:[%s4586_s9 + $0x8] sm:$0xff] }
 0x39c   :  { %3006 = vmatmul.msk.bf16.vlgmr.msra.gmra.mxu2 %vm1764_vm9, %v3005_v21  ;;  %3007 = vmatmul.msk.bf16.vlgmr.msra.gmra.mxu3 %vm1764_vm9, %v3005_v21  ;;  %v2434_v21 = vsel %vm708_vm4, %v2421_v57, 0 }
 0x39d   :  { %2040 = vmatpush.bf16.msrb.mxu2 %v3356_v53  ;;  %2231 = vmatpush.bf16.msra.mxu3 %v3375_v29  ;;  %v3389_v29 = vld [vmem:[%s4584_s7 + $0x18] sm:$0xff] }
 0x3a1   :  { %2041 = vmatpush.bf16.msrb.mxu2 %v3355_v0  ;;  %2232 = vmatpush.bf16.msra.mxu3 %v3374_v18 }
 0x3a5   :  { %2042 = vmatpush.bf16.msrb.mxu2 %v3354_v1  ;;  %2233 = vmatpush.bf16.msra.mxu3 %v3373_v27 }
 0x3a9   :  { %2043 = vmatpush.bf16.msrb.mxu2 %v3353_v41  ;;  %2234 = vmatpush.bf16.msra.mxu3 %v3372_v7 }
 0x3ad   :  { %2044 = vmatpush.bf16.msrb.mxu2 %v3352_v16  ;;  %2235 = vmatpush.bf16.msra.mxu3 %v3371_v20 }
 0x3b1   :  { %2045 = vmatpush.bf16.msrb.mxu2 %v3351_v23 }
 0x3b5   :  { %2289 = vmatpush.bf16.msra.mxu2 %v3380_v31  ;;  %v3388_v31 = vld [vmem:[%s4584_s7 + $0x10] sm:$0xff] }
 0x3b9   :  { %2290 = vmatpush.bf16.msra.mxu2 %v3379_v44  ;;  %v3399_v44 = vld [vmem:[%s4583_s6] ss:$0 sm:$0xff] }
 0x3bd   :  { %2291 = vmatpush.bf16.msra.mxu2 %v3378_v36 }
 0x3c1   :  { %2292 = vmatpush.bf16.msra.mxu2 %v3377_v28 }
 0x3c5   :  { %2293 = vmatpush.bf16.msra.mxu2 %v3376_v49 }
 0x40f   :  { %v1783_v11 = vpop.f32.mrf.mxu2  ;;  %v1797_v13 = vpop.f32.mrf.mxu3 }
 0x417   :  { %v1785_v14 = vpop.f32.mrf.mxu2  ;;  %v1799_v10 = vpop.f32.mrf.mxu3 }
 0x41f   :  { %v1821_v34 = vpop.f32.mrf.mxu2  ;;  %v1835_v43 = vpop.f32.mrf.mxu3 }
 0x420   :  { %v1840_v48 = vmax.f32 %v1783_v11, %v1821_v34  ;;  %v1841_v3 = vmax.f32 %v1797_v13, %v1835_v43  ;;  %v3386_v11 = vld [vmem:[%s4584_s7] sm:$0xff]  ;;  %v2460_v13 = vld [vmem:[%s4586_s9 + $0x28] sm:$0x3] }
 0x421   :  { %v2487_v9 = vunpack.c.l.b16 %v2460_v13  ;;  %v3397_v34 = vld [vmem:[%s4586_s9 + $0x20] sm:$0xff] }
 0x423   :  { %v2493_v12 = vpack.c.b16 %v2487_v9, %v2487_v9 }
 0x427   :  { %v1823_v15 = vpop.f32.mrf.mxu2  ;;  %v1837_v17 = vpop.f32.mrf.mxu3 }
 0x428   :  { %v1842_v6 = vmax.f32 %v1785_v14, %v1823_v15  ;;  %v1843_v5 = vmax.f32 %v1799_v10, %v1837_v17  ;;  %v2503_v10 = vsel %vm1197_vm6, %v2493_v12, 0  ;;  %v3396_v15 = vld [vmem:[%s4586_s9 + $0x18] sm:$0xff] }
 0x42a   :  { %v1864_v45 = vpack.c.bf16 %v1842_v6, %v1840_v48  ;;  %v1865_v59 = vpack.c.bf16 %v1843_v5, %v1841_v3  ;;  %v3395_v6 = vld [vmem:[%s4586_s9 + $0x10] sm:$0xff] }
 0x42c   :  { %2046 = vmatmul.bf16.vlgmr.msrb.gmra.mxu2 %v1864_v45  ;;  %3089 = vmatmul.msk.bf16.vlgmr.msrb.gmra.mxu3 %vm1926_vm10, %v1865_v59 }
 0x42d   :  { %1938 = vmatmul.bf16.vlgmr.msrb.gmra.mxu0 %v1864_v45  ;;  %3048 = vmatmul.msk.bf16.vlgmr.msrb.gmra.mxu1 %vm1926_vm10, %v1865_v59 }
 0x42e   :  { %2347 = vmatpush.bf16.msrb.mxu0 %v3385_v47  ;;  %2436 = vmatpush.bf16.msrb.mxu1 %v2434_v21  ;;  %v3400_v47 = vld [vmem:[%s4585_s8] ss:$0 sm:$0xff]  ;;  %s3432_s8 = smov [#allocation2]  }
 0x42f   :  { %2507 = vmatpush.bf16.msrb.mxu3 %v2503_v10  ;;  %s2537_s9 = sshll.u32 %s3432_s8, 4  ;;  %s2538_s9 = int_to_ptr.vmem [resolvable:$true] %s2537_s9 }
 0x432   :  { %2348 = vmatpush.bf16.msrb.mxu0 %v3384_v38  ;;  %2437 = vmatpush.bf16.msrb.mxu1 %v3392_v33 }
 0x433   :  { %2508 = vmatpush.bf16.msrb.mxu3 %v3397_v34 }
 0x436   :  { %2349 = vmatpush.bf16.msrb.mxu0 %v3383_v39  ;;  %2438 = vmatpush.bf16.msrb.mxu1 %v3391_v4 }
 0x437   :  { %2509 = vmatpush.bf16.msrb.mxu3 %v3396_v15 }
 0x43a   :  { %2350 = vmatpush.bf16.msrb.mxu0 %v3382_v40  ;;  %2439 = vmatpush.bf16.msrb.mxu1 %v3390_v25 }
 0x43b   :  { %2510 = vmatpush.bf16.msrb.mxu3 %v3395_v6 }
 0x43e   :  { %2351 = vmatpush.bf16.msrb.mxu0 %v3381_v51  ;;  %2440 = vmatpush.bf16.msrb.mxu1 %v3389_v29  ;;  %v3401_v51 = vld [vmem:[%s4587_s10] ss:$0 sm:$0xff] }
 0x43f   :  { %2511 = vmatpush.bf16.msrb.mxu3 %v3394_v46 }
 0x442   :  { %2441 = vmatpush.bf16.msrb.mxu1 %v3388_v31 }
 0x443   :  { %2512 = vmatpush.bf16.msrb.mxu3 %v3393_v8 }
 0x446   :  { %2442 = vmatpush.bf16.msrb.mxu1 %v3387_v30 }
 0x44a   :  { %2443 = vmatpush.bf16.msrb.mxu1 %v3386_v11 }
 0x4aa   :  { %v1939_v58 = vpop.f32.mrf.mxu0  ;;  %v1953_v35 = vpop.f32.mrf.mxu1 }
 0x4ab   :  { %v1954_v54 = vadd.f32 %v1953_v35, %v1939_v58 }
 0x4af   :  { %v2047_v37 = vpop.f32.mrf.mxu2  ;;  %v2061_v53 = vpop.f32.mrf.mxu3 }
 0x4b0   :  { %v2062_v55 = vadd.f32 %v2061_v53, %v2047_v37 }
 0x4b2   :  { %v2066_v0 = vmax.f32 %v1954_v54, %v2062_v55  ;;  %v1941_v42 = vpop.f32.mrf.mxu0  ;;  %v1955_v19 = vpop.f32.mrf.mxu1 }
 0x4b3   :  { %v1956_v23 = vadd.f32 %v1955_v19, %v1941_v42 }
 0x4b4   :  { %v2078_v1 = vpack.c.bf16 %v2066_v0, %v2066_v0 }
 0x4b6   :  { %v2090_v56 = vrot.slane %v2078_v1, 1  ;;  %v2194_v63 = vrot.slane %v2078_v1, 2  ;;  %v2252_v41 = vrot.slane %v2078_v1, 3  ;;  %3131 = vmatmul.msk.bf16.vlgmr.msra.gmra.mxu1 %vm2121_vm11, %v2078_v1 }
 0x4b7   :  { %v2049_v32 = vpop.f32.mrf.mxu2  ;;  %v2063_v16 = vpop.f32.mrf.mxu3 }
 0x4b8   :  { %3110 = vmatmul.msk.bf16.vlgmr.msra.gmra.mxu0 %vm2121_vm11, %v2090_v56  ;;  %3152 = vmatmul.msk.bf16.vlgmr.msra.gmra.mxu3 %vm2121_vm11, %v2194_v63  ;;  %v2064_v22 = vadd.f32 %v2063_v16, %v2049_v32 }
 0x4b9   :  { %3173 = vmatmul.msk.bf16.vlgmr.msra.gmra.mxu2 %vm2121_vm11, %v2252_v41 }
 0x4ba   :  { %v2067_v24 = vmax.f32 %v1956_v23, %v2064_v22 }
 0x4bc   :  { %v2310_v2 = vpack.c.bf16 %v2067_v24, %v2067_v24 }
 0x4c8   :  { %3194 = vmatmul.msk.bf16.vlgmr.msrb.gmra.mxu0 %vm2121_vm11, %v2310_v2 }
 0x533   :  { %v2180_v14 = vpop.f32.mrf.mxu1 }
 0x535   :  { %v2134_v43 = vpop.f32.mrf.mxu0 }
 0x536   :  { %v2181_v45 = vadd.f32 %v2180_v14, %v2134_v43 }
 0x53b   :  { %v2237_v17 = vpop.f32.mrf.mxu3  ;;  %v2182_v48 = vpop.f32.mrf.mxu1 }
 0x53c   :  { %v2295_v3 = vpop.f32.mrf.mxu2  ;;  %v2241_v59 = vadd.f32 %v2237_v17, %v2181_v45 }
 0x53d   :  { %v2136_v5 = vpop.f32.mrf.mxu0 }
 0x53e   :  { %v2299_v18 = vadd.f32 %v2295_v3, %v2241_v59 }
 0x543   :  { %v2239_v60 = vpop.f32.mrf.mxu3 }
 0x544   :  { %v2297_v26 = vpop.f32.mrf.mxu2 }
 0x545   :  { %v2353_v27 = vpop.f32.mrf.mxu0 }
 0x546   :  { %v2357_v36 = vadd.f32 %v2353_v27, %v2299_v18 }
 0x548   :  { %v2362_v61 = vadd.f32 %v3399_v44, %v2357_v36 }
 0x54a   :  { %v2363_v62 = vmax.f32 %v2362_v61, 0.0 }
 0x54c   :  { %v2379_v7 = vpack.c.bf16 %v2363_v62, %v2363_v62 }
 0x54d   :  { %v2355_v28 = vpop.f32.mrf.mxu0 }
 0x54e   :  { %3223 = vmatmul.msk.bf16.vlgmr.msrb.gmra.mxu1 %vm2429_vm12, %v2379_v7 }
 0x5cb   :  { %v2445_v20 = vpop.f32.mrf.mxu1 }
 0x5cc   :  { %v2446_v49 = vadd.f32 %v3400_v47, %v2445_v20 }
 0x5ce   :  { %v2449_v38 = vmax.f32 %v2446_v49, 0.0 }
 0x5d0   :  { %v2461_v39 = vpack.c.bf16 %v2449_v38, %v2449_v38 }
 0x5d2   :  { %3244 = vmatmul.msk.bf16.vlgmr.msrb.gmra.mxu3 %vm1190_vm8, %v2461_v39 }
 0x5d3   :  { %v2447_v40 = vpop.f32.mrf.mxu1 }
 0x655   :  { %v2514_v52 = vpop.f32.mrf.mxu3 }
 0x656   :  { %v2515_v50 = vadd.f32 %v3401_v51, %v2514_v52 }
 0x658   :  { %v2519_v57 = vsel %vm2518_vm13, %v2515_v50, -inf }
 0x659   :  { %2520 = vmax.xlane.f32.xlu0 %v2519_v57 }
 0x65d   :  { %v2516_v58 = vpop.f32.mrf.mxu3 }
 0x6cc   :  { %v2521_v35 = vpop.xlane.xlu0 %2520 }
 0x6cd   :  { %v2522_v21 = vsub.f32 %v2515_v50, %v2521_v35 }
 0x6cf   :  { %v2523_v33 = vmul.f32 1.442695, %v2522_v21 }
 0x6d1   :  { %3402 = vpow2.f32 %v2523_v33 }
 0x6d7   :  { %v3403_v37 = vpop.eup %3402 }
 0x6d8   :  { %v2525_v53 = vsel %vm2518_vm13, %v3403_v37, 0.0 }
 0x6d9   :  { %2526 = vadd.xlane.f32.xlu0 %v2525_v53 }
 0x74c   :  { %v2527_v54 = vpop.xlane.xlu0 %2526 }
 0x74d   :  { %3404 = vlog2.f32 %v2527_v54 }
 0x753   :  { %v3405_v55 = vpop.eup %3404 }
 0x754   :  { %v2529_v0 = vmul.f32 0.6931472, %v3405_v55 }
 0x756   :  { %v2530_v1 = vsub.f32 %v2522_v21, %v2529_v0 }
 0x758   :  { %2531 = vst.msk [vmem:[#allocation2] sm:$0x3] %vm2518_vm13, %v2530_v1 }
 0x759   :  { %2542 = dma.vmem_to_hbm [thread:$0]  %s2538_s9, 32, %s2540_s28, [#allocation3]  }
 0x75a   :  { %3430 = dma.done.wait [#allocation3], 32  }
 0x75b   :  { %3431 = vsyncadd [#allocation3], 4294967264 }
 0x75c   :  { %2547 = vsyncpa [#allocation3], 1 }

</bundles_post_ra>
